<compile_context>
chip_gen: v6e
topology: v6e:2x2x1
jax: 0.10.0
libtpu: 0.0.40
codegen_flags: <defaults>
</compile_context>

<pallas_src>
import jax
import jax.numpy as jnp
from jax.experimental import pallas as pl
from jax.experimental.pallas import tpu as pltpu


# ----------------------------------------------------------------------------
# In-kernel helpers (only proven-safe Mosaic ops: 2-D matmuls, slices, concats,
# elementwise, sublane reductions).
# ----------------------------------------------------------------------------
def _shifted_rows(xf):
    """Build the [row y-1 | row y | row y+1] slab for the banded 3x3 conv.

    xf: (H, W*Cin) fused activations.  Vertical 'same' padding is realised by
    zero-filled shifted copies; horizontal padding is inside the band weights.
    """
    h = xf.shape[0]
    zrow = jnp.zeros((1, xf.shape[1]), xf.dtype)
    prev_rows = jnp.concatenate([zrow, xf[:h - 1, :]], axis=0)   # input row y-1
    next_rows = jnp.concatenate([xf[1:, :], zrow], axis=0)       # input row y+1
    return jnp.concatenate([prev_rows, xf, next_rows], axis=1)   # (H, 3*W*Cin)


def _banded_conv3x3(xf_bf16, bw_bf16):
    """3x3 'same' conv as a single lane-dense MXU matmul (bf16 in, f32 acc)."""
    return jnp.dot(_shifted_rows(xf_bf16), bw_bf16,
                   preferred_element_type=jnp.float32)           # (H, W*Cout) f32


def _tile_bn_stats(y, sel):
    """Per-tile BatchNorm partial stats: (tile mean, sum of centered squares).

    y:   (H, W*C) f32 fused pre-BN activations of this tile.
    sel: (W*C, C) 0/1 channel-fold selector (folds the fused lane dim to C).
    Centered-within-tile sums avoid the E[x^2]-mean^2 cancellation; tiles are
    combined Chan-style in the wrapper.
    """
    c = sel.shape[1]
    reps = y.shape[1] // c
    n_pix = y.shape[0] * reps
    mean = jnp.sum(jnp.dot(y, sel, preferred_element_type=jnp.float32),
                   axis=0, keepdims=True) * (1.0 / n_pix)        # (1, C)
    mean_f = jnp.concatenate([mean] * reps, axis=1)              # (1, W*C)
    centered = y - mean_f
    m2 = jnp.sum(jnp.dot(centered * centered, sel,
                         preferred_element_type=jnp.float32),
                 axis=0, keepdims=True)                          # (1, C)
    return jnp.concatenate([mean, m2], axis=0)                   # (2, C)


# ----------------------------------------------------------------------------
# Kernels (grid = (N,), one batch element per step, all axes "parallel").
# ----------------------------------------------------------------------------
def _up_conv1_kernel(x1f_ref, x2f_ref, mh_ref, mwk_ref, bw1a_ref, bw1b_ref,
                     sel_ref, y1_ref, st1_ref):
    # Fused align_corners bilinear upsample of x1: two interpolation matmuls in
    # the (w, c)-fused layout (kron(Mw, I) keeps channels interleaved, no
    # reshapes / gathers, no HBM round trip).
    x1u = jnp.dot(jnp.dot(mh_ref[...], x1f_ref[0],
                          preferred_element_type=jnp.float32),
                  mwk_ref[...], preferred_element_type=jnp.float32)  # (H, W*C1)

    # conv1 on concat([x2, x1_up]) == conv on x2 with w1[:, :, :C2] plus conv on
    # x1_up with w1[:, :, C2:]  ->  two banded matmuls, no channel interleaving.
    y = (_banded_conv3x3(x2f_ref[0].astype(jnp.bfloat16), bw1a_ref[...])
         + _banded_conv3x3(x1u.astype(jnp.bfloat16), bw1b_ref[...]))  # (H, W*Cmid)

    y1_ref[0] = y                                    # lane-dense (W*Cmid) store
    st1_ref[0] = _tile_bn_stats(y, sel_ref[...])     # per-tile BN1 partial stats


def _conv2_kernel(y1_ref, sc1_ref, sh1_ref, bw2_ref, sel_ref, y2_ref, st2_ref):
    # Apply global BN1 (precomputed scale/shift, tiled over the fused lanes) +
    # ReLU, then conv2 as one banded matmul.
    a = jnp.maximum(y1_ref[0] * sc1_ref[...] + sh1_ref[...], 0.0)   # (H, W*Cmid)
    y = _banded_conv3x3(a.astype(jnp.bfloat16), bw2_ref[...])       # (H, W*Cout)
    y2_ref[0] = y
    st2_ref[0] = _tile_bn_stats(y, sel_ref[...])


def _bn_relu_kernel(y_ref, sc_ref, sh_ref, o_ref):
    # Finalize: global BN2 apply + ReLU (elementwise, lane-dense).
    o_ref[0] = jnp.maximum(y_ref[0] * sc_ref[...] + sh_ref[...], 0.0)


# ----------------------------------------------------------------------------
# Wrapper-side operator construction (tiny static matrices, XLA plumbing only).
# ----------------------------------------------------------------------------
def _interp_matrix(n_in, n_out):
    """Row-interpolation matrix of torch Upsample(bilinear, align_corners=True)."""
    if n_out == 1:
        src = jnp.zeros((1,), jnp.float32)
    else:
        src = jnp.arange(n_out, dtype=jnp.float32) * ((n_in - 1) / (n_out - 1))
    lo = jnp.clip(jnp.floor(src).astype(jnp.int32), 0, n_in - 1)
    hi = jnp.clip(lo + 1, 0, n_in - 1)
    frac = src - lo.astype(jnp.float32)
    rows = jnp.arange(n_out)
    m = jnp.zeros((n_out, n_in), jnp.float32)
    m = m.at[rows, lo].add(1.0 - frac)
    m = m.at[rows, hi].add(frac)
    return m


def _banded_conv_weights(w_hwio, out_w):
    """Fold a 3x3 stride-1 pad-1 conv into a (3*W*Cin, W*Cout) banded matrix.

    out_fused(H, W*Cout) = [rows_{y-1} | rows_y | rows_{y+1}] @ B where rows is
    the (H, W*Cin) fused activation.  Horizontal 'same' padding is absorbed in
    the band structure (out-of-range taps simply have no rows).
    """
    kh, kw, cin, cout = w_hwio.shape
    assert kh == 3 and kw == 3
    xs = jnp.arange(out_w)
    dx = xs[:, None] - xs[None, :] + 1            # dx[x_in, x_out]
    valid = (dx >= 0) & (dx <= 2)
    dxc = jnp.clip(dx, 0, 2)
    parts = []
    for dy in range(3):
        wd = w_hwio[dy]                           # (3, cin, cout)
        b = jnp.where(valid[:, :, None, None], wd[dxc], 0.0)   # (Win, Wout, cin, cout)
        b = jnp.transpose(b, (0, 2, 1, 3)).reshape(out_w * cin, out_w * cout)
        parts.append(b)
    return jnp.concatenate(parts, axis=0)         # (3*W*cin, W*cout)


def _combine_bn_stats(st, gamma, beta, pix_per_tile, eps=1e-5):
    """Chan-style combination of per-tile (mean, M2) -> global BN scale/shift."""
    mean_t, m2_t = st[:, 0, :], st[:, 1, :]
    mean = jnp.mean(mean_t, axis=0)
    m2 = jnp.sum(m2_t, axis=0) + pix_per_tile * jnp.sum((mean_t - mean) ** 2, axis=0)
    var = m2 / (st.shape[0] * pix_per_tile)       # biased var (BN training mode)
    scale = gamma * jax.lax.rsqrt(var + eps)
    shift = beta - mean * scale
    return scale, shift


def up_forward(x1_nchw, x2_nchw, params):
    """Full `Up.forward`: inputs NCHW, output NCHW."""
    n, c1, hs, ws = x1_nchw.shape
    _, c2, h, w = x2_nchw.shape
    w1, w2 = params["w1"], params["w2"]
    cmid, cout = w1.shape[-1], w2.shape[-1]

    # ---- layout plumbing: NCHW -> fused (w, c) rows (free XLA reshapes) ----
    x1f = jnp.transpose(x1_nchw, (0, 2, 3, 1)).reshape(n, hs, ws * c1)
    x2f = jnp.transpose(x2_nchw, (0, 2, 3, 1)).reshape(n, h, w * c2)

    # ---- static operator matrices (tiny) ----
    mh = _interp_matrix(hs, h)                                      # (H, Hs)
    mw = _interp_matrix(ws, w)                                      # (W, Ws)
    mwk = jnp.einsum('pw,cd->wcpd', mw,
                     jnp.eye(c1, dtype=jnp.float32)).reshape(ws * c1, w * c1)
    bw1a = _banded_conv_weights(w1[:, :, :c2, :], w).astype(jnp.bfloat16)
    bw1b = _banded_conv_weights(w1[:, :, c2:, :], w).astype(jnp.bfloat16)
    bw2 = _banded_conv_weights(w2, w).astype(jnp.bfloat16)
    sel_mid = jnp.tile(jnp.eye(cmid, dtype=jnp.float32), (w, 1))    # (W*Cmid, Cmid)
    sel_out = jnp.tile(jnp.eye(cout, dtype=jnp.float32), (w, 1))    # (W*Cout, Cout)

    batch3 = lambda shape: pl.BlockSpec((1,) + tuple(shape[1:]),
                                        lambda i: (i, 0, 0))
    full2 = lambda shape: pl.BlockSpec(tuple(shape), lambda i: (0, 0))
    parallel = pltpu.CompilerParams(dimension_semantics=("parallel",))

    # ---- pass 1: fused upsample + conv1 (pre-BN) + per-tile BN1 stats ----
    flops1 = n * 2 * (h * hs * ws * c1 + h * (ws * c1) * (w * c1)
                      + h * 3 * w * (c1 + c2) * (w * cmid)
                      + 2 * h * (w * cmid) * cmid)
    bytes1 = 4 * (x1f.size + x2f.size + mh.size + mwk.size + sel_mid.size
                  + n * h * w * cmid + n * 2 * cmid) + 2 * (bw1a.size + bw1b.size)
    y1_pre, st1 = pl.pallas_call(
        _up_conv1_kernel,
        out_shape=(jax.ShapeDtypeStruct((n, h, w * cmid), jnp.float32),
                   jax.ShapeDtypeStruct((n, 2, cmid), jnp.float32)),
        grid=(n,),
        in_specs=[batch3(x1f.shape), batch3(x2f.shape),
                  full2(mh.shape), full2(mwk.shape),
                  full2(bw1a.shape), full2(bw1b.shape), full2(sel_mid.shape)],
        out_specs=(batch3((n, h, w * cmid)), batch3((n, 2, cmid))),
        compiler_params=parallel,
        cost_estimate=pl.CostEstimate(flops=int(flops1), transcendentals=0,
                                      bytes_accessed=int(bytes1)),
    )(x1f, x2f, mh, mwk, bw1a, bw1b, sel_mid)

    sc1, sh1 = _combine_bn_stats(st1, params["g1"], params["b1"], h * w)
    sc1f = jnp.tile(sc1, (w,))[None, :]            # (1, W*Cmid), fused lanes
    sh1f = jnp.tile(sh1, (w,))[None, :]

    # ---- pass 2: BN1 apply + ReLU + conv2 (pre-BN) + per-tile BN2 stats ----
    flops2 = n * 2 * (h * 3 * w * cmid * (w * cout) + 2 * h * (w * cout) * cout)
    bytes2 = 4 * (y1_pre.size + sc1f.size + sh1f.size + sel_out.size
                  + n * h * w * cout + n * 2 * cout) + 2 * bw2.size
    y2_pre, st2 = pl.pallas_call(
        _conv2_kernel,
        out_shape=(jax.ShapeDtypeStruct((n, h, w * cout), jnp.float32),
                   jax.ShapeDtypeStruct((n, 2, cout), jnp.float32)),
        grid=(n,),
        in_specs=[batch3(y1_pre.shape), full2(sc1f.shape), full2(sh1f.shape),
                  full2(bw2.shape), full2(sel_out.shape)],
        out_specs=(batch3((n, h, w * cout)), batch3((n, 2, cout))),
        compiler_params=parallel,
        cost_estimate=pl.CostEstimate(flops=int(flops2), transcendentals=0,
                                      bytes_accessed=int(bytes2)),
    )(y1_pre, sc1f, sh1f, bw2, sel_out)

    sc2, sh2 = _combine_bn_stats(st2, params["g2"], params["b2"], h * w)
    sc2f = jnp.tile(sc2, (w,))[None, :]
    sh2f = jnp.tile(sh2, (w,))[None, :]

    # ---- pass 3: BN2 apply + ReLU (lightweight finalize) ----
    out_f = pl.pallas_call(
        _bn_relu_kernel,
        out_shape=jax.ShapeDtypeStruct((n, h, w * cout), jnp.float32),
        grid=(n,),
        in_specs=[batch3(y2_pre.shape), full2(sc2f.shape), full2(sh2f.shape)],
        out_specs=batch3((n, h, w * cout)),
        compiler_params=parallel,
        cost_estimate=pl.CostEstimate(
            flops=int(2 * n * h * w * cout), transcendentals=0,
            bytes_accessed=int(8 * n * h * w * cout + 16 * w * cout)),
    )(y2_pre, sc2f, sh2f)

    # fused (w, c) output -> NHWC -> NCHW (wrapper-side plumbing only).
    return jnp.transpose(out_f.reshape(n, h, w, cout), (0, 3, 1, 2))


# ----------------------------------------------------------------------------
# Pure-JAX references (PyTorch semantics).
# ----------------------------------------------------------------------------
def bilinear_upsample_ac(x_nhwc, scale):
    """torch.nn.Upsample(scale_factor, mode='bilinear', align_corners=True)."""
    _, H, W, _ = x_nhwc.shape
    Ho, Wo = H * scale, W * scale

    def coords(n_in, n_out):
        src = (jnp.zeros((n_out,), jnp.float32) if n_out == 1 else
               jnp.arange(n_out, dtype=jnp.float32) * (n_in - 1) / (n_out - 1))
        lo = jnp.clip(jnp.floor(src).astype(jnp.int32), 0, n_in - 1)
        hi = jnp.clip(lo + 1, 0, n_in - 1)
        return lo, hi, src - lo.astype(jnp.float32)

    h0, h1, fh = coords(H, Ho)
    w0, w1, fw = coords(W, Wo)
    xh = (x_nhwc[:, h0] * (1.0 - fh)[None, :, None, None]
          + x_nhwc[:, h1] * fh[None, :, None, None])
    return (xh[:, :, w0] * (1.0 - fw)[None, None, :, None]
            + xh[:, :, w1] * fw[None, None, :, None])


def ref_forward(x1_nchw, x2_nchw, params, matmul_dtype=jnp.float32):
    """matmul_dtype=bfloat16 mirrors the kernel's bf16-operand MXU contract."""
    x1 = jnp.transpose(x1_nchw, (0, 2, 3, 1))
    x2 = jnp.transpose(x2_nchw, (0, 2, 3, 1))
    x = jnp.concatenate([x2, bilinear_upsample_ac(x1, 2)], axis=-1)

    def conv(x, w):
        return jax.lax.conv_general_dilated(
            x.astype(matmul_dtype), w.astype(matmul_dtype), (1, 1), "SAME",
            dimension_numbers=("NHWC", "HWIO", "NHWC"),
            preferred_element_type=jnp.float32,
            precision=jax.lax.Precision.HIGHEST)

    def bn_relu(x, g, b):
        m = jnp.mean(x, axis=(0, 1, 2), keepdims=True)
        v = jnp.mean((x - m) ** 2, axis=(0, 1, 2), keepdims=True)
        y = (x - m) * jax.lax.rsqrt(v + 1e-5) * g.reshape(1, 1, 1, -1) \
            + b.reshape(1, 1, 1, -1)
        return jnp.maximum(y, 0.0)

    y = bn_relu(conv(x, params["w1"]), params["g1"], params["b1"])
    z = bn_relu(conv(y, params["w2"]), params["g2"], params["b2"])
    return jnp.transpose(z, (0, 3, 1, 2))


if __name__ == "__main__":
    key = jax.random.PRNGKey(0)
    k = jax.random.split(key, 8)

    # Small shapes consistent with the module:
    #   x1: (2, 4, 8, 8)  -> upsampled to 16x16 ; x2: (2, 4, 16, 16)
    #   in_channels = 4 + 4 = 8, out_channels = 8
    N, C1, C2, Hs, Hl, Cout = 2, 4, 4, 8, 16, 8
    Cin_cat = C1 + C2

    x1 = jax.random.normal(k[0], (N, C1, Hs, Hs), jnp.float32)
    x2 = jax.random.normal(k[1], (N, C2, Hl, Hl), jnp.float32)

    params = {
        "w1": 0.2 * jax.random.normal(k[2], (3, 3, Cin_cat, Cout), jnp.float32),
        "w2": 0.2 * jax.random.normal(k[3], (3, 3, Cout, Cout), jnp.float32),
        "g1": 1.0 + 0.1 * jax.random.normal(k[4], (Cout,), jnp.float32),
        "b1": 0.1 * jax.random.normal(k[5], (Cout,), jnp.float32),
        "g2": 1.0 + 0.1 * jax.random.normal(k[6], (Cout,), jnp.float32),
        "b2": 0.1 * jax.random.normal(k[7], (Cout,), jnp.float32),
    }

    up_fn = jax.jit(up_forward)
    out = jax.block_until_ready(up_fn(x1, x2, params))
    assert out.shape == (N, Cout, Hl, Hl), out.shape

    # 1) Structural check: matched-precision reference (bf16 conv operands,
    #    f32 accumulation).  Tolerance absorbs banded-vs-direct summation order
    #    and the in-kernel f32 interpolation matmuls.
    ref_matched = jax.block_until_ready(ref_forward(x1, x2, params, jnp.bfloat16))
    if not jnp.allclose(out, ref_matched, atol=5e-2, rtol=5e-2):
        err = float(jnp.max(jnp.abs(out - ref_matched)))
        raise AssertionError(f"mismatch vs matched-precision ref, max abs err={err}")

    # 2) Fidelity check vs the exact f32 module: tolerance set by the deliberate
    #    bf16-operand MXU contract.
    ref_f32 = jax.block_until_ready(ref_forward(x1, x2, params, jnp.float32))
    if not jnp.allclose(out, ref_f32, atol=1.5e-1, rtol=1.5e-1):
        err = float(jnp.max(jnp.abs(out - ref_f32)))
        raise AssertionError(f"mismatch vs f32 ref beyond bf16 tolerance, max abs err={err}")

    print("KERNEL_OK")
</pallas_src>

<mosaic_0001>
module attributes {stable_mosaic.version = 11 : i64} {
  func.func private @main(%arg0: i32) attributes {dimension_semantics = [#tpu.dimension_semantics<core_parallel>], iteration_bounds = array<i64: 2>, tpu.core_type = #tpu.core_type<sc_scalar_subcore>, window_params = []} {
    return
  }
}

module attributes {stable_mosaic.version = 11 : i64} {
  func.func private @main(%arg0: i32) attributes {dimension_semantics = [#tpu.dimension_semantics<core_parallel>], iteration_bounds = array<i64: 2>, tpu.core_type = #tpu.core_type<sc_scalar_subcore>, window_params = []} {
    return
  }
}

module attributes {stable_mosaic.version = 11 : i64} {
  func.func @_bn_relu_kernel(%arg0: i32, %arg1: memref<1x16x128xf32, #tpu.memory_space<vmem>>, %arg2: memref<1x128xf32, #tpu.memory_space<vmem>>, %arg3: memref<1x128xf32, #tpu.memory_space<vmem>>, %arg4: memref<1x16x128xf32, #tpu.memory_space<vmem>>) attributes {dimension_semantics = [#tpu.dimension_semantics<parallel>], iteration_bounds = array<i64: 2>, scalar_prefetch = 0 : i64, scratch_operands = 0 : i64, tpu.core_type = #tpu.core_type<tc>, window_params = [{transform_indices = @transform_0, window_bounds = array<i64: 1, 16, 128>}, {pipeline_mode = #tpu.pipeline_mode<synchronous>, transform_indices = @transform_1, window_bounds = array<i64: 1, 128>}, {pipeline_mode = #tpu.pipeline_mode<synchronous>, transform_indices = @transform_2, window_bounds = array<i64: 1, 128>}, {transform_indices = @transform_3, window_bounds = array<i64: 1, 16, 128>}]} {
    %c0 = arith.constant 0 : index
    %c0_0 = arith.constant 0 : index
    %c0_1 = arith.constant 0 : index
    %0 = vector.load %arg1[%c0, %c0_0, %c0_1] : memref<1x16x128xf32, #tpu.memory_space<vmem>>, vector<1x16x128xf32>
    %1 = vector.shape_cast %0 : vector<1x16x128xf32> to vector<16x128xf32>
    %c0_2 = arith.constant 0 : index
    %c0_3 = arith.constant 0 : index
    %2 = vector.load %arg2[%c0_2, %c0_3] : memref<1x128xf32, #tpu.memory_space<vmem>>, vector<1x128xf32>
    %3 = vector.broadcast %2 : vector<1x128xf32> to vector<16x128xf32>
    %4 = arith.mulf %1, %3 : vector<16x128xf32>
    %c0_4 = arith.constant 0 : index
    %c0_5 = arith.constant 0 : index
    %5 = vector.load %arg3[%c0_4, %c0_5] : memref<1x128xf32, #tpu.memory_space<vmem>>, vector<1x128xf32>
    %6 = vector.broadcast %5 : vector<1x128xf32> to vector<16x128xf32>
    %7 = arith.addf %4, %6 : vector<16x128xf32>
    %cst = arith.constant 0.000000e+00 : f32
    %8 = vector.broadcast %cst : f32 to vector<16x128xf32>
    %9 = arith.maximumf %7, %8 : vector<16x128xf32>
    %c0_6 = arith.constant 0 : index
    %c0_7 = arith.constant 0 : index
    %c0_8 = arith.constant 0 : index
    %10 = vector.load %arg4[%c0_6, %c0_7, %c0_8] : memref<1x16x128xf32, #tpu.memory_space<vmem>>, vector<1x16x128xf32>
    %11 = vector.shape_cast %10 : vector<1x16x128xf32> to vector<16x128xf32>
    %12 = vector.shape_cast %9 : vector<16x128xf32> to vector<1x16x128xf32>
    tpu.vector_store %arg4[%c0_6, %c0_7, %c0_8], %12 {strides = array<i32>} : memref<1x16x128xf32, #tpu.memory_space<vmem>>, vector<1x16x128xf32>,
    return
  }
  func.func @transform_0(%arg0: i32) -> (i32, i32, i32) {
    %c0_i32 = arith.constant 0 : i32
    %c0_i32_0 = arith.constant 0 : i32
    %c0_i32_1 = arith.constant 0 : i32
    return %arg0, %c0_i32, %c0_i32_0 : i32, i32, i32
  }
  func.func @transform_1(%arg0: i32) -> (i32, i32) {
    %c0_i32 = arith.constant 0 : i32
    %c0_i32_0 = arith.constant 0 : i32
    %c0_i32_1 = arith.constant 0 : i32
    return %c0_i32, %c0_i32_0 : i32, i32
  }
  func.func @transform_2(%arg0: i32) -> (i32, i32) {
    %c0_i32 = arith.constant 0 : i32
    %c0_i32_0 = arith.constant 0 : i32
    %c0_i32_1 = arith.constant 0 : i32
    return %c0_i32, %c0_i32_0 : i32, i32
  }
  func.func @transform_3(%arg0: i32) -> (i32, i32, i32) {
    %c0_i32 = arith.constant 0 : i32
    %c0_i32_0 = arith.constant 0 : i32
    %c0_i32_1 = arith.constant 0 : i32
    return %arg0, %c0_i32, %c0_i32_0 : i32, i32, i32
  }
}

module attributes {stable_mosaic.version = 11 : i64} {
  func.func @_conv2_kernel(%arg0: i32, %arg1: memref<1x16x128xf32, #tpu.memory_space<vmem>>, %arg2: memref<1x128xf32, #tpu.memory_space<vmem>>, %arg3: memref<1x128xf32, #tpu.memory_space<vmem>>, %arg4: memref<384x128xbf16, #tpu.memory_space<vmem>>, %arg5: memref<128x8xf32, #tpu.memory_space<vmem>>, %arg6: memref<1x16x128xf32, #tpu.memory_space<vmem>>, %arg7: memref<1x2x8xf32, #tpu.memory_space<vmem>>) attributes {dimension_semantics = [#tpu.dimension_semantics<parallel>], iteration_bounds = array<i64: 2>, scalar_prefetch = 0 : i64, scratch_operands = 0 : i64, tpu.core_type = #tpu.core_type<tc>, window_params = [{transform_indices = @transform_0, window_bounds = array<i64: 1, 16, 128>}, {pipeline_mode = #tpu.pipeline_mode<synchronous>, transform_indices = @transform_1, window_bounds = array<i64: 1, 128>}, {pipeline_mode = #tpu.pipeline_mode<synchronous>, transform_indices = @transform_2, window_bounds = array<i64: 1, 128>}, {pipeline_mode = #tpu.pipeline_mode<synchronous>, transform_indices = @transform_3, window_bounds = array<i64: 384, 128>}, {pipeline_mode = #tpu.pipeline_mode<synchronous>, transform_indices = @transform_4, window_bounds = array<i64: 128, 8>}, {transform_indices = @transform_5, window_bounds = array<i64: 1, 16, 128>}, {transform_indices = @transform_6, window_bounds = array<i64: 1, 2, 8>}]} {
    %c0 = arith.constant 0 : index
    %c0_0 = arith.constant 0 : index
    %c0_1 = arith.constant 0 : index
    %0 = vector.load %arg1[%c0, %c0_0, %c0_1] : memref<1x16x128xf32, #tpu.memory_space<vmem>>, vector<1x16x128xf32>
    %1 = vector.shape_cast %0 : vector<1x16x128xf32> to vector<16x128xf32>
    %c0_2 = arith.constant 0 : index
    %c0_3 = arith.constant 0 : index
    %2 = vector.load %arg2[%c0_2, %c0_3] : memref<1x128xf32, #tpu.memory_space<vmem>>, vector<1x128xf32>
    %3 = vector.broadcast %2 : vector<1x128xf32> to vector<16x128xf32>
    %4 = arith.mulf %1, %3 : vector<16x128xf32>
    %c0_4 = arith.constant 0 : index
    %c0_5 = arith.constant 0 : index
    %5 = vector.load %arg3[%c0_4, %c0_5] : memref<1x128xf32, #tpu.memory_space<vmem>>, vector<1x128xf32>
    %6 = vector.broadcast %5 : vector<1x128xf32> to vector<16x128xf32>
    %7 = arith.addf %4, %6 : vector<16x128xf32>
    %cst = arith.constant 0.000000e+00 : f32
    %8 = vector.broadcast %cst : f32 to vector<16x128xf32>
    %9 = arith.maximumf %7, %8 : vector<16x128xf32>
    %10 = arith.truncf %9 : vector<16x128xf32> to vector<16x128xbf16>
    %c0_6 = arith.constant 0 : index
    %c0_7 = arith.constant 0 : index
    %11 = vector.load %arg4[%c0_6, %c0_7] : memref<384x128xbf16, #tpu.memory_space<vmem>>, vector<384x128xbf16>
    %cst_8 = arith.constant 0.000000e+00 : bf16
    %12 = vector.broadcast %cst_8 : bf16 to vector<1x128xbf16>
    %13 = vector.extract_strided_slice %10 {offsets = [0, 0], sizes = [15, 128], strides = [1, 1]} : vector<16x128xbf16> to vector<15x128xbf16>
    %14 = tpu.concatenate %12, %13 in 0 : vector<1x128xbf16>, vector<15x128xbf16> -> vector<16x128xbf16>
    %15 = vector.extract_strided_slice %10 {offsets = [1, 0], sizes = [15, 128], strides = [1, 1]} : vector<16x128xbf16> to vector<15x128xbf16>
    %16 = tpu.concatenate %15, %12 in 0 : vector<15x128xbf16>, vector<1x128xbf16> -> vector<16x128xbf16>
    %17 = tpu.concatenate %14, %10, %16 in 1 : vector<16x128xbf16>, vector<16x128xbf16>, vector<16x128xbf16> -> vector<16x384xbf16>
    %cst_9 = arith.constant dense<0.000000e+00> : vector<16x128xf32>
    %18 = tpu.matmul %17, %11, %cst_9 {dimension_numbers = #tpu.dot_dimension_numbers<[1], [0], [0], [1], [0, 0, 1, 1], [], []>} : vector<16x384xbf16>, vector<384x128xbf16>, vector<16x128xf32> -> vector<16x128xf32>
    %c0_10 = arith.constant 0 : index
    %c0_11 = arith.constant 0 : index
    %c0_12 = arith.constant 0 : index
    %19 = vector.load %arg6[%c0_10, %c0_11, %c0_12] : memref<1x16x128xf32, #tpu.memory_space<vmem>>, vector<1x16x128xf32>
    %20 = vector.shape_cast %19 : vector<1x16x128xf32> to vector<16x128xf32>
    %21 = vector.shape_cast %18 : vector<16x128xf32> to vector<1x16x128xf32>
    tpu.vector_store %arg6[%c0_10, %c0_11, %c0_12], %21 {strides = array<i32>} : memref<1x16x128xf32, #tpu.memory_space<vmem>>, vector<1x16x128xf32>,
    %c0_13 = arith.constant 0 : index
    %c0_14 = arith.constant 0 : index
    %22 = vector.load %arg5[%c0_13, %c0_14] : memref<128x8xf32, #tpu.memory_space<vmem>>, vector<128x8xf32>
    %cst_15 = arith.constant dense<0.000000e+00> : vector<16x8xf32>
    %23 = tpu.matmul %18, %22, %cst_15 {dimension_numbers = #tpu.dot_dimension_numbers<[1], [0], [0], [1], [0, 0, 1, 1], [], []>} : vector<16x128xf32>, vector<128x8xf32>, vector<16x8xf32> -> vector<16x8xf32>
    %cst_16 = arith.constant dense<0.000000e+00> : vector<8xf32>
    %24 = vector.multi_reduction <add>, %23, %cst_16 [0] : vector<16x8xf32> to vector<8xf32>
    %25 = vector.shape_cast %24 : vector<8xf32> to vector<1x8xf32>
    %cst_17 = arith.constant 3.906250e-03 : f32
    %26 = vector.broadcast %cst_17 : f32 to vector<1x8xf32>
    %27 = arith.mulf %25, %26 : vector<1x8xf32>
    %28 = tpu.concatenate %27, %27, %27, %27, %27, %27, %27, %27, %27, %27, %27, %27, %27, %27, %27, %27 in 1 : vector<1x8xf32>, vector<1x8xf32>, vector<1x8xf32>, vector<1x8xf32>, vector<1x8xf32>, vector<1x8xf32>, vector<1x8xf32>, vector<1x8xf32>, vector<1x8xf32>, vector<1x8xf32>, vector<1x8xf32>, vector<1x8xf32>, vector<1x8xf32>, vector<1x8xf32>, vector<1x8xf32>, vector<1x8xf32> -> vector<1x128xf32>
    %29 = vector.broadcast %28 : vector<1x128xf32> to vector<16x128xf32>
    %30 = arith.subf %18, %29 : vector<16x128xf32>
    %31 = arith.mulf %30, %30 : vector<16x128xf32>
    %cst_18 = arith.constant dense<0.000000e+00> : vector<16x8xf32>
    %32 = tpu.matmul %31, %22, %cst_18 {dimension_numbers = #tpu.dot_dimension_numbers<[1], [0], [0], [1], [0, 0, 1, 1], [], []>} : vector<16x128xf32>, vector<128x8xf32>, vector<16x8xf32> -> vector<16x8xf32>
    %cst_19 = arith.constant dense<0.000000e+00> : vector<8xf32>
    %33 = vector.multi_reduction <add>, %32, %cst_19 [0] : vector<16x8xf32> to vector<8xf32>
    %34 = vector.shape_cast %33 : vector<8xf32> to vector<1x8xf32>
    %35 = tpu.concatenate %27, %34 in 0 : vector<1x8xf32>, vector<1x8xf32> -> vector<2x8xf32>
    %c0_20 = arith.constant 0 : index
    %c0_21 = arith.constant 0 : index
    %c0_22 = arith.constant 0 : index
    %36 = vector.load %arg7[%c0_20, %c0_21, %c0_22] : memref<1x2x8xf32, #tpu.memory_space<vmem>>, vector<1x2x8xf32>
    %37 = vector.shape_cast %36 : vector<1x2x8xf32> to vector<2x8xf32>
    %38 = vector.shape_cast %35 : vector<2x8xf32> to vector<1x2x8xf32>
    tpu.vector_store %arg7[%c0_20, %c0_21, %c0_22], %38 {strides = array<i32>} : memref<1x2x8xf32, #tpu.memory_space<vmem>>, vector<1x2x8xf32>,
    return
  }
  func.func @transform_0(%arg0: i32) -> (i32, i32, i32) {
    %c0_i32 = arith.constant 0 : i32
    %c0_i32_0 = arith.constant 0 : i32
    %c0_i32_1 = arith.constant 0 : i32
    return %arg0, %c0_i32, %c0_i32_0 : i32, i32, i32
  }
  func.func @transform_1(%arg0: i32) -> (i32, i32) {
    %c0_i32 = arith.constant 0 : i32
    %c0_i32_0 = arith.constant 0 : i32
    %c0_i32_1 = arith.constant 0 : i32
    return %c0_i32, %c0_i32_0 : i32, i32
  }
  func.func @transform_2(%arg0: i32) -> (i32, i32) {
    %c0_i32 = arith.constant 0 : i32
    %c0_i32_0 = arith.constant 0 : i32
    %c0_i32_1 = arith.constant 0 : i32
    return %c0_i32, %c0_i32_0 : i32, i32
  }
  func.func @transform_3(%arg0: i32) -> (i32, i32) {
    %c0_i32 = arith.constant 0 : i32
    %c0_i32_0 = arith.constant 0 : i32
    %c0_i32_1 = arith.constant 0 : i32
    return %c0_i32, %c0_i32_0 : i32, i32
  }
  func.func @transform_4(%arg0: i32) -> (i32, i32) {
    %c0_i32 = arith.constant 0 : i32
    %c0_i32_0 = arith.constant 0 : i32
    %c0_i32_1 = arith.constant 0 : i32
    return %c0_i32, %c0_i32_0 : i32, i32
  }
  func.func @transform_5(%arg0: i32) -> (i32, i32, i32) {
    %c0_i32 = arith.constant 0 : i32
    %c0_i32_0 = arith.constant 0 : i32
    %c0_i32_1 = arith.constant 0 : i32
    return %arg0, %c0_i32, %c0_i32_0 : i32, i32, i32
  }
  func.func @transform_6(%arg0: i32) -> (i32, i32, i32) {
    %c0_i32 = arith.constant 0 : i32
    %c0_i32_0 = arith.constant 0 : i32
    %c0_i32_1 = arith.constant 0 : i32
    return %arg0, %c0_i32, %c0_i32_0 : i32, i32, i32
  }
}

module attributes {stable_mosaic.version = 11 : i64} {
  func.func @_up_conv1_kernel(%arg0: i32, %arg1: memref<1x8x32xf32, #tpu.memory_space<vmem>>, %arg2: memref<1x16x64xf32, #tpu.memory_space<vmem>>, %arg3: memref<16x8xf32, #tpu.memory_space<vmem>>, %arg4: memref<32x64xf32, #tpu.memory_space<vmem>>, %arg5: memref<192x128xbf16, #tpu.memory_space<vmem>>, %arg6: memref<192x128xbf16, #tpu.memory_space<vmem>>, %arg7: memref<128x8xf32, #tpu.memory_space<vmem>>, %arg8: memref<1x16x128xf32, #tpu.memory_space<vmem>>, %arg9: memref<1x2x8xf32, #tpu.memory_space<vmem>>) attributes {dimension_semantics = [#tpu.dimension_semantics<parallel>], iteration_bounds = array<i64: 2>, scalar_prefetch = 0 : i64, scratch_operands = 0 : i64, tpu.core_type = #tpu.core_type<tc>, window_params = [{transform_indices = @transform_0, window_bounds = array<i64: 1, 8, 32>}, {transform_indices = @transform_1, window_bounds = array<i64: 1, 16, 64>}, {pipeline_mode = #tpu.pipeline_mode<synchronous>, transform_indices = @transform_2, window_bounds = array<i64: 16, 8>}, {pipeline_mode = #tpu.pipeline_mode<synchronous>, transform_indices = @transform_3, window_bounds = array<i64: 32, 64>}, {pipeline_mode = #tpu.pipeline_mode<synchronous>, transform_indices = @transform_4, window_bounds = array<i64: 192, 128>}, {pipeline_mode = #tpu.pipeline_mode<synchronous>, transform_indices = @transform_5, window_bounds = array<i64: 192, 128>}, {pipeline_mode = #tpu.pipeline_mode<synchronous>, transform_indices = @transform_6, window_bounds = array<i64: 128, 8>}, {transform_indices = @transform_7, window_bounds = array<i64: 1, 16, 128>}, {transform_indices = @transform_8, window_bounds = array<i64: 1, 2, 8>}]} {
    %c0 = arith.constant 0 : index
    %c0_0 = arith.constant 0 : index
    %0 = vector.load %arg3[%c0, %c0_0] : memref<16x8xf32, #tpu.memory_space<vmem>>, vector<16x8xf32>
    %c0_1 = arith.constant 0 : index
    %c0_2 = arith.constant 0 : index
    %c0_3 = arith.constant 0 : index
    %1 = vector.load %arg1[%c0_1, %c0_2, %c0_3] : memref<1x8x32xf32, #tpu.memory_space<vmem>>, vector<1x8x32xf32>
    %2 = vector.shape_cast %1 : vector<1x8x32xf32> to vector<8x32xf32>
    %cst = arith.constant dense<0.000000e+00> : vector<16x32xf32>
    %3 = tpu.matmul %0, %2, %cst {dimension_numbers = #tpu.dot_dimension_numbers<[1], [0], [0], [1], [0, 0, 1, 1], [], []>} : vector<16x8xf32>, vector<8x32xf32>, vector<16x32xf32> -> vector<16x32xf32>
    %c0_4 = arith.constant 0 : index
    %c0_5 = arith.constant 0 : index
    %4 = vector.load %arg4[%c0_4, %c0_5] : memref<32x64xf32, #tpu.memory_space<vmem>>, vector<32x64xf32>
    %cst_6 = arith.constant dense<0.000000e+00> : vector<16x64xf32>
    %5 = tpu.matmul %3, %4, %cst_6 {dimension_numbers = #tpu.dot_dimension_numbers<[1], [0], [0], [1], [0, 0, 1, 1], [], []>} : vector<16x32xf32>, vector<32x64xf32>, vector<16x64xf32> -> vector<16x64xf32>
    %c0_7 = arith.constant 0 : index
    %c0_8 = arith.constant 0 : index
    %c0_9 = arith.constant 0 : index
    %6 = vector.load %arg2[%c0_7, %c0_8, %c0_9] : memref<1x16x64xf32, #tpu.memory_space<vmem>>, vector<1x16x64xf32>
    %7 = vector.shape_cast %6 : vector<1x16x64xf32> to vector<16x64xf32>
    %8 = arith.truncf %7 : vector<16x64xf32> to vector<16x64xbf16>
    %c0_10 = arith.constant 0 : index
    %c0_11 = arith.constant 0 : index
    %9 = vector.load %arg5[%c0_10, %c0_11] : memref<192x128xbf16, #tpu.memory_space<vmem>>, vector<192x128xbf16>
    %cst_12 = arith.constant 0.000000e+00 : bf16
    %10 = vector.broadcast %cst_12 : bf16 to vector<1x64xbf16>
    %11 = vector.extract_strided_slice %8 {offsets = [0, 0], sizes = [15, 64], strides = [1, 1]} : vector<16x64xbf16> to vector<15x64xbf16>
    %12 = tpu.concatenate %10, %11 in 0 : vector<1x64xbf16>, vector<15x64xbf16> -> vector<16x64xbf16>
    %13 = vector.extract_strided_slice %8 {offsets = [1, 0], sizes = [15, 64], strides = [1, 1]} : vector<16x64xbf16> to vector<15x64xbf16>
    %14 = tpu.concatenate %13, %10 in 0 : vector<15x64xbf16>, vector<1x64xbf16> -> vector<16x64xbf16>
    %15 = tpu.concatenate %12, %8, %14 in 1 : vector<16x64xbf16>, vector<16x64xbf16>, vector<16x64xbf16> -> vector<16x192xbf16>
    %cst_13 = arith.constant dense<0.000000e+00> : vector<16x128xf32>
    %16 = tpu.matmul %15, %9, %cst_13 {dimension_numbers = #tpu.dot_dimension_numbers<[1], [0], [0], [1], [0, 0, 1, 1], [], []>} : vector<16x192xbf16>, vector<192x128xbf16>, vector<16x128xf32> -> vector<16x128xf32>
    %17 = arith.truncf %5 : vector<16x64xf32> to vector<16x64xbf16>
    %c0_14 = arith.constant 0 : index
    %c0_15 = arith.constant 0 : index
    %18 = vector.load %arg6[%c0_14, %c0_15] : memref<192x128xbf16, #tpu.memory_space<vmem>>, vector<192x128xbf16>
    %cst_16 = arith.constant 0.000000e+00 : bf16
    %19 = vector.broadcast %cst_16 : bf16 to vector<1x64xbf16>
    %20 = vector.extract_strided_slice %17 {offsets = [0, 0], sizes = [15, 64], strides = [1, 1]} : vector<16x64xbf16> to vector<15x64xbf16>
    %21 = tpu.concatenate %19, %20 in 0 : vector<1x64xbf16>, vector<15x64xbf16> -> vector<16x64xbf16>
    %22 = vector.extract_strided_slice %17 {offsets = [1, 0], sizes = [15, 64], strides = [1, 1]} : vector<16x64xbf16> to vector<15x64xbf16>
    %23 = tpu.concatenate %22, %19 in 0 : vector<15x64xbf16>, vector<1x64xbf16> -> vector<16x64xbf16>
    %24 = tpu.concatenate %21, %17, %23 in 1 : vector<16x64xbf16>, vector<16x64xbf16>, vector<16x64xbf16> -> vector<16x192xbf16>
    %cst_17 = arith.constant dense<0.000000e+00> : vector<16x128xf32>
    %25 = tpu.matmul %24, %18, %cst_17 {dimension_numbers = #tpu.dot_dimension_numbers<[1], [0], [0], [1], [0, 0, 1, 1], [], []>} : vector<16x192xbf16>, vector<192x128xbf16>, vector<16x128xf32> -> vector<16x128xf32>
    %26 = arith.addf %16, %25 : vector<16x128xf32>
    %c0_18 = arith.constant 0 : index
    %c0_19 = arith.constant 0 : index
    %c0_20 = arith.constant 0 : index
    %27 = vector.load %arg8[%c0_18, %c0_19, %c0_20] : memref<1x16x128xf32, #tpu.memory_space<vmem>>, vector<1x16x128xf32>
    %28 = vector.shape_cast %27 : vector<1x16x128xf32> to vector<16x128xf32>
    %29 = vector.shape_cast %26 : vector<16x128xf32> to vector<1x16x128xf32>
    tpu.vector_store %arg8[%c0_18, %c0_19, %c0_20], %29 {strides = array<i32>} : memref<1x16x128xf32, #tpu.memory_space<vmem>>, vector<1x16x128xf32>,
    %c0_21 = arith.constant 0 : index
    %c0_22 = arith.constant 0 : index
    %30 = vector.load %arg7[%c0_21, %c0_22] : memref<128x8xf32, #tpu.memory_space<vmem>>, vector<128x8xf32>
    %cst_23 = arith.constant dense<0.000000e+00> : vector<16x8xf32>
    %31 = tpu.matmul %26, %30, %cst_23 {dimension_numbers = #tpu.dot_dimension_numbers<[1], [0], [0], [1], [0, 0, 1, 1], [], []>} : vector<16x128xf32>, vector<128x8xf32>, vector<16x8xf32> -> vector<16x8xf32>
    %cst_24 = arith.constant dense<0.000000e+00> : vector<8xf32>
    %32 = vector.multi_reduction <add>, %31, %cst_24 [0] : vector<16x8xf32> to vector<8xf32>
    %33 = vector.shape_cast %32 : vector<8xf32> to vector<1x8xf32>
    %cst_25 = arith.constant 3.906250e-03 : f32
    %34 = vector.broadcast %cst_25 : f32 to vector<1x8xf32>
    %35 = arith.mulf %33, %34 : vector<1x8xf32>
    %36 = tpu.concatenate %35, %35, %35, %35, %35, %35, %35, %35, %35, %35, %35, %35, %35, %35, %35, %35 in 1 : vector<1x8xf32>, vector<1x8xf32>, vector<1x8xf32>, vector<1x8xf32>, vector<1x8xf32>, vector<1x8xf32>, vector<1x8xf32>, vector<1x8xf32>, vector<1x8xf32>, vector<1x8xf32>, vector<1x8xf32>, vector<1x8xf32>, vector<1x8xf32>, vector<1x8xf32>, vector<1x8xf32>, vector<1x8xf32> -> vector<1x128xf32>
    %37 = vector.broadcast %36 : vector<1x128xf32> to vector<16x128xf32>
    %38 = arith.subf %26, %37 : vector<16x128xf32>
    %39 = arith.mulf %38, %38 : vector<16x128xf32>
    %cst_26 = arith.constant dense<0.000000e+00> : vector<16x8xf32>
    %40 = tpu.matmul %39, %30, %cst_26 {dimension_numbers = #tpu.dot_dimension_numbers<[1], [0], [0], [1], [0, 0, 1, 1], [], []>} : vector<16x128xf32>, vector<128x8xf32>, vector<16x8xf32> -> vector<16x8xf32>
    %cst_27 = arith.constant dense<0.000000e+00> : vector<8xf32>
    %41 = vector.multi_reduction <add>, %40, %cst_27 [0] : vector<16x8xf32> to vector<8xf32>
    %42 = vector.shape_cast %41 : vector<8xf32> to vector<1x8xf32>
    %43 = tpu.concatenate %35, %42 in 0 : vector<1x8xf32>, vector<1x8xf32> -> vector<2x8xf32>
    %c0_28 = arith.constant 0 : index
    %c0_29 = arith.constant 0 : index
    %c0_30 = arith.constant 0 : index
    %44 = vector.load %arg9[%c0_28, %c0_29, %c0_30] : memref<1x2x8xf32, #tpu.memory_space<vmem>>, vector<1x2x8xf32>
    %45 = vector.shape_cast %44 : vector<1x2x8xf32> to vector<2x8xf32>
    %46 = vector.shape_cast %43 : vector<2x8xf32> to vector<1x2x8xf32>
    tpu.vector_store %arg9[%c0_28, %c0_29, %c0_30], %46 {strides = array<i32>} : memref<1x2x8xf32, #tpu.memory_space<vmem>>, vector<1x2x8xf32>,
    return
  }
  func.func @transform_0(%arg0: i32) -> (i32, i32, i32) {
    %c0_i32 = arith.constant 0 : i32
    %c0_i32_0 = arith.constant 0 : i32
    %c0_i32_1 = arith.constant 0 : i32
    return %arg0, %c0_i32, %c0_i32_0 : i32, i32, i32
  }
  func.func @transform_1(%arg0: i32) -> (i32, i32, i32) {
    %c0_i32 = arith.constant 0 : i32
    %c0_i32_0 = arith.constant 0 : i32
    %c0_i32_1 = arith.constant 0 : i32
    return %arg0, %c0_i32, %c0_i32_0 : i32, i32, i32
  }
  func.func @transform_2(%arg0: i32) -> (i32, i32) {
    %c0_i32 = arith.constant 0 : i32
    %c0_i32_0 = arith.constant 0 : i32
    %c0_i32_1 = arith.constant 0 : i32
    return %c0_i32, %c0_i32_0 : i32, i32
  }
  func.func @transform_3(%arg0: i32) -> (i32, i32) {
    %c0_i32 = arith.constant 0 : i32
    %c0_i32_0 = arith.constant 0 : i32
    %c0_i32_1 = arith.constant 0 : i32
    return %c0_i32, %c0_i32_0 : i32, i32
  }
  func.func @transform_4(%arg0: i32) -> (i32, i32) {
    %c0_i32 = arith.constant 0 : i32
    %c0_i32_0 = arith.constant 0 : i32
    %c0_i32_1 = arith.constant 0 : i32
    return %c0_i32, %c0_i32_0 : i32, i32
  }
  func.func @transform_5(%arg0: i32) -> (i32, i32) {
    %c0_i32 = arith.constant 0 : i32
    %c0_i32_0 = arith.constant 0 : i32
    %c0_i32_1 = arith.constant 0 : i32
    return %c0_i32, %c0_i32_0 : i32, i32
  }
  func.func @transform_6(%arg0: i32) -> (i32, i32) {
    %c0_i32 = arith.constant 0 : i32
    %c0_i32_0 = arith.constant 0 : i32
    %c0_i32_1 = arith.constant 0 : i32
    return %c0_i32, %c0_i32_0 : i32, i32
  }
  func.func @transform_7(%arg0: i32) -> (i32, i32, i32) {
    %c0_i32 = arith.constant 0 : i32
    %c0_i32_0 = arith.constant 0 : i32
    %c0_i32_1 = arith.constant 0 : i32
    return %arg0, %c0_i32, %c0_i32_0 : i32, i32, i32
  }
  func.func @transform_8(%arg0: i32) -> (i32, i32, i32) {
    %c0_i32 = arith.constant 0 : i32
    %c0_i32_0 = arith.constant 0 : i32
    %c0_i32_1 = arith.constant 0 : i32
    return %arg0, %c0_i32, %c0_i32_0 : i32, i32, i32
  }
}

</mosaic_0001>

<bundles_post_ra>
// kernel: tile.43
= control target key start
LH: loop header
LB: loop body
LE: loop exit
PB: predicated region body
PF: predicated region fallthrough
CT: control target
= control target key end

     0   :  { %s28_s0 = inlined_call_operand.vmem [shape: f32[8], index: 0, kind: input, shape index: {}]   ;;  %s29_s1 = inlined_call_operand.vmem [shape: f32[16,8], index: 1, kind: output, shape index: {}]  }
   0x1   :  { %v4_v0 = vld [vmem:[%s28_s0] ss:$0 sm:$0xff] }
   0x2   :  { %5 = vst [vmem:[%s29_s1] sm:$0xff] %v4_v0  ;;  %8 = vst [vmem:[%s29_s1 + $0x8] sm:$0xff] %v4_v0 }

// kernel: tile.44
= control target key start
LH: loop header
LB: loop body
LE: loop exit
PB: predicated region body
PF: predicated region fallthrough
CT: control target
= control target key end

     0   :  { %s133_s10 = smov 120   ;;  %s134_s11 = smov 104   ;;  %vm3_vm0 = vcmask 64512   ;;  %vm9_vm1 = vcmask 1048512   ;;  %vm15_vm2 = vcmask 982912   ;;  %vm21_vm3 = vcmask 917312   ;;  %s209_s0 = inlined_call_operand.vmem [shape: f32[16,8], index: 0, kind: input, shape index: {}]   ;;  %s210_s1 = inlined_call_operand.vmem [shape: f32[1,128], index: 1, kind: output, shape index: {}]  }
   0x1   :  { %v103_v0 = vld [vmem:[%s209_s0 + $0xf] sm:$0x1]   ;;  %v105_v1 = vld [vmem:[%s209_s0 + $0xd] sm:$0x1]   ;;  %v104_v2 = vld [vmem:[%s209_s0 + $0xe] sm:$0x1]  }
   0x2   :  { %7 = vrot.lane.b32.xlu0 %v103_v0, %s133_s10  ;;  %19 = vrot.lane.b32.xlu1 %v105_v1, %s134_s11  ;;  %v106_v3 = vld [vmem:[%s209_s0 + $0xc] sm:$0x1]   ;;  %s135_s16 = smov 112   ;;  %s136_s17 = smov 96   ;;  %v107_v4 = vld [vmem:[%s209_s0 + $0xb] sm:$0x1]  }
   0x3   :  { %v108_v5 = vld [vmem:[%s209_s0 + $0xa] sm:$0x1]   ;;  %v2_v6 = vld [vmem:[%s209_s0] sm:$0x1]   ;;  %s137_s24 = smov 88   ;;  %s138_s25 = smov 80  }
   0x4   :  { %4 = vst.msk [vmem:[#allocation0] sm:$0x1] %vm3_vm0, %v2_v6   ;;  %v109_v7 = vld [vmem:[%s209_s0 + $0x9] sm:$0x1]   ;;  %v110_v8 = vld [vmem:[%s209_s0 + $0x8] sm:$0x1]  }
   0x5   :  { %s139_s30 = smov 72   ;;  %s140_s2 = smov 64   ;;  %v111_v9 = vld [vmem:[%s209_s0 + $0x7] sm:$0x1]   ;;  %v112_v10 = vld [vmem:[%s209_s0 + $0x6] sm:$0x1]  }
   0x6   :  { %13 = vrot.lane.b32.xlu0 %v104_v2, %s135_s16  ;;  %25 = vrot.lane.b32.xlu1 %v106_v3, %s136_s17  ;;  %s141_s7 = smov 56   ;;  %s142_s8 = smov 48   ;;  %v113_v11 = vld [vmem:[%s209_s0 + $0x5] sm:$0x1]   ;;  %v114_v12 = vld [vmem:[%s209_s0 + $0x4] sm:$0x1]  }
   0x7   :  { %s143_s13 = smov 40   ;;  %s144_s14 = smov 32   ;;  %v115_v13 = vld [vmem:[%s209_s0 + $0x3] sm:$0x1]   ;;  %v116_v14 = vld [vmem:[%s209_s0 + $0x2] sm:$0x1]  }
   0x8   :  { %s145_s19 = smov 24   ;;  %s146_s20 = smov 16   ;;  %v117_v15 = vld [vmem:[%s209_s0 + $0x1] sm:$0x1]   ;;  %vm27_vm4 = vcmask 851712   ;;  %vm33_vm5 = vcmask 786112  }
   0x9   :  { %s147_s0 = smov 8   ;;  %vm39_vm6 = vcmask 720512   ;;  %vm45_vm7 = vcmask 654912   ;;  %vm51_vm8 = vcmask 589312   ;;  %vm57_vm9 = vcmask 523712  }
   0xa   :  { %31 = vrot.lane.b32.xlu0 %v107_v4, %s137_s24  ;;  %37 = vrot.lane.b32.xlu1 %v108_v5, %s138_s25  ;;  %vm63_vm10 = vcmask 458112   ;;  %vm69_vm11 = vcmask 392512   ;;  %vm75_vm12 = vcmask 326912   ;;  %vm81_vm13 = vcmask 261312  }
   0xb   :  { %vm87_vm14 = vcmask 195712   ;;  %vm93_vm15 = vcmask 130112  }
   0xe   :  { %43 = vrot.lane.b32.xlu0 %v109_v7, %s139_s30  ;;  %49 = vrot.lane.b32.xlu1 %v110_v8, %s140_s2 }
  0x12   :  { %55 = vrot.lane.b32.xlu0 %v111_v9, %s141_s7  ;;  %61 = vrot.lane.b32.xlu1 %v112_v10, %s142_s8 }
  0x16   :  { %67 = vrot.lane.b32.xlu0 %v113_v11, %s143_s13  ;;  %73 = vrot.lane.b32.xlu1 %v114_v12, %s144_s14 }
  0x1a   :  { %79 = vrot.lane.b32.xlu0 %v115_v13, %s145_s19  ;;  %85 = vrot.lane.b32.xlu1 %v116_v14, %s146_s20 }
  0x1e   :  { %91 = vrot.lane.b32.xlu0 %v117_v15, %s147_s0 }
  0x74   :  { %v8_v16 = vpop.permute.xlu0 %7   ;;  %v20_v17 = vpop.permute.xlu1 %19  }
  0x75   :  { %10 = vst.msk [vmem:[#allocation0] sm:$0x1] %vm9_vm1, %v8_v16  }
  0x78   :  { %v14_v18 = vpop.permute.xlu0 %13   ;;  %v26_v19 = vpop.permute.xlu1 %25  }
  0x79   :  { %16 = vst.msk [vmem:[#allocation0] sm:$0x1] %vm15_vm2, %v14_v18  }
  0x7a   :  { %22 = vst.msk [vmem:[#allocation0] sm:$0x1] %vm21_vm3, %v20_v17  }
  0x7b   :  { %28 = vst.msk [vmem:[#allocation0] sm:$0x1] %vm27_vm4, %v26_v19  }
  0x7c   :  { %v32_v20 = vpop.permute.xlu0 %31   ;;  %v38_v21 = vpop.permute.xlu1 %37  }
  0x7d   :  { %34 = vst.msk [vmem:[#allocation0] sm:$0x1] %vm33_vm5, %v32_v20  }
  0x7e   :  { %40 = vst.msk [vmem:[#allocation0] sm:$0x1] %vm39_vm6, %v38_v21  }
  0x80   :  { %v44_v22 = vpop.permute.xlu0 %43   ;;  %v50_v23 = vpop.permute.xlu1 %49  }
  0x81   :  { %46 = vst.msk [vmem:[#allocation0] sm:$0x1] %vm45_vm7, %v44_v22  }
  0x82   :  { %52 = vst.msk [vmem:[#allocation0] sm:$0x1] %vm51_vm8, %v50_v23  }
  0x84   :  { %v56_v24 = vpop.permute.xlu0 %55   ;;  %v62_v25 = vpop.permute.xlu1 %61  }
  0x85   :  { %58 = vst.msk [vmem:[#allocation0] sm:$0x1] %vm57_vm9, %v56_v24  }
  0x86   :  { %64 = vst.msk [vmem:[#allocation0] sm:$0x1] %vm63_vm10, %v62_v25  }
  0x88   :  { %v68_v26 = vpop.permute.xlu0 %67   ;;  %v74_v27 = vpop.permute.xlu1 %73  }
  0x89   :  { %70 = vst.msk [vmem:[#allocation0] sm:$0x1] %vm69_vm11, %v68_v26  }
  0x8a   :  { %76 = vst.msk [vmem:[#allocation0] sm:$0x1] %vm75_vm12, %v74_v27  }
  0x8c   :  { %v80_v28 = vpop.permute.xlu0 %79   ;;  %v86_v29 = vpop.permute.xlu1 %85  }
  0x8d   :  { %82 = vst.msk [vmem:[#allocation0] sm:$0x1] %vm81_vm13, %v80_v28  }
  0x8e   :  { %88 = vst.msk [vmem:[#allocation0] sm:$0x1] %vm87_vm14, %v86_v29  }
  0x90   :  { %v92_v30 = vpop.permute.xlu0 %91  }
  0x91   :  { %94 = vst.msk [vmem:[#allocation0] sm:$0x1] %vm93_vm15, %v92_v30  }
  0x98   :  { %v99_v31 = vld [vmem:[#allocation0] sm:$0x1] }
  0x99   :  { %102 = vst [vmem:[%s210_s1] sm:$0x1] %v99_v31 }

// kernel: up_forward.5
= control target key start
LH: loop header
LB: loop body
LE: loop exit
PB: predicated region body
PF: predicated region fallthrough
CT: control target
= control target key end

     0   :  { %s301_s12 = smov 0   ;;  %s318_s0 = inlined_call_operand.vmem [shape: f32[2,16,128], index: 0, kind: input, shape index: {}]   ;;  %s319_s1 = inlined_call_operand.vmem [shape: f32[1,128], index: 1, kind: input, shape index: {}]   ;;  %s320_s2 = inlined_call_operand.vmem [shape: f32[1,128], index: 2, kind: input, shape index: {}]   ;;  %s321_s3 = inlined_call_operand.vmem [shape: f32[2,16,128], index: 3, kind: output, shape index: {}]  }
   0x1 LB: > { %s250_s13 = sadd.s32 4294967295, %s279_s12   ;;  %p254_p0 = scmp.ge.s32.totalorder %s279_s12, 1  ;;  %s279_s12 = sphi %s301_s12, %s13_s12  }
   0x2   : > { %p137_p1 = scmp.lt.s32.totalorder %s279_s12, 3 }
   0x4   : > { %p138_p2 = pnand %p254_p0, %p137_p1 }
   0x5   : > { %p161_p3 = scmp.lt.s32.totalorder (!%p138_p2), %s250_s13, 1 }
   0x6   : > { %141 = sbr.rel (%p138_p2) target bundleno = 22 (0x16), region = 32 }
   0xb   : > { %s323_s13 = smov (!%p161_p3, %s250_s13), 1  ;;  %v259_v0 = vld [vmem:[%s319_s1] ss:$0 sm:$0xff] }
   0xc   : > { %s263_s14 = sshll.u32 %s323_s13, 4  ;;  %v260_v3 = vld [vmem:[%s320_s2] ss:$0 sm:$0xff] }
   0xd   : > { %s165_s19 = scalar_lea.vmem %s318_s0, %s263_s14  ;;  %s170_s24 = scalar_lea.vmem %s321_s3, %s263_s14 }
   0xe   : > { %v171_v1 = vld [vmem:[%s165_s19] sm:$0xff]  ;;  %v172_v2 = vld [vmem:[%s165_s19 + $0x8] sm:$0xff] }
   0xf   : > { %v180_v4 = vmul.f32 %v259_v0, %v171_v1  ;;  %v181_v5 = vmul.f32 %v259_v0, %v172_v2 }
  0x11   : > { %v189_v6 = vadd.f32 %v260_v3, %v180_v4  ;;  %v190_v7 = vadd.f32 %v260_v3, %v181_v5 }
  0x13   : > { %v191_v8 = vmax.f32 %v189_v6, 0.0  ;;  %v192_v9 = vmax.f32 %v190_v7, 0.0 }
  0x15   : > { %193 = vst [vmem:[%s170_s24] sm:$0xff] %v191_v8  ;;  %194 = vst [vmem:[%s170_s24 + $0x8] sm:$0xff] %v192_v9 }
  0x16 PF: > { %s13_s12 = sadd.s32 1, %s279_s12  }
  0x17   : > { %p10_p4 = scmp.ge.s32.totalorder %s13_s12, 4  }
  0x19   :  { %12 = sbr.rel (!%p10_p4) target bundleno = 1 (0x1), region = 62 }

// kernel: up_forward.4
= control target key start
LH: loop header
LB: loop body
LE: loop exit
PB: predicated region body
PF: predicated region fallthrough
CT: control target
= control target key end

     0   :  { %s1247_s21 = smov 0   ;;  %s1450_s0 = inlined_call_operand.vmem [shape: f32[2,16,128], index: 0, kind: input, shape index: {}]   ;;  %s1451_s1 = inlined_call_operand.vmem [shape: f32[1,128], index: 1, kind: input, shape index: {}]   ;;  %s1452_s2 = inlined_call_operand.vmem [shape: f32[1,128], index: 2, kind: input, shape index: {}]   ;;  %s1453_s3 = inlined_call_operand.vmem [shape: bf16[384,128], index: 3, kind: input, shape index: {}]   ;;  %s1454_s4 = inlined_call_operand.vmem [shape: f32[128,8], index: 4, kind: input, shape index: {}]   ;;  %s1455_s5 = inlined_call_operand.vmem [shape: f32[2,16,128], index: 5, kind: output, shape index: {0}]   ;;  %s1456_s6 = inlined_call_operand.vmem [shape: f32[2,2,8], index: 6, kind: output, shape index: {1}]  }
   0x1 LB: > { %s941_s22 = sadd.s32 4294967295, %s1193_s21   ;;  %p945_p0 = scmp.ge.s32.totalorder %s1193_s21, 1  ;;  %s1193_s21 = sphi %s1247_s21, %s17_s21  }
   0x2   : > { %p215_p1 = scmp.lt.s32.totalorder %s1193_s21, 3 }
   0x4   : > { %p216_p2 = pnand %p945_p0, %p215_p1 }
   0x5   : > { %p249_p3 = scmp.lt.s32.totalorder (!%p216_p2), %s941_s22, 1  ;;  %s1198_s28 = smov (!%p216_p2), 8  }
   0x6   : > { %219 = sbr.rel (%p216_p2) target bundleno = 823 (0x337), region = 40  ;;  %s1199_s29 = smov (!%p216_p2), 32  }
   0x7   : > { %s1200_s30 = smov (!%p216_p2), 16   ;;  %s1201_s7 = smov (!%p216_p2), 48  }
   0x8   : > { %s1202_s8 = smov (!%p216_p2), 40   ;;  %s1203_s10 = smov (!%p216_p2), 64  }
   0x9   : > { %s1204_s11 = smov (!%p216_p2), 56   ;;  %s1205_s12 = smov (!%p216_p2), 80  }
   0xa   : > { %s1206_s13 = smov (!%p216_p2), 72   ;;  %s1207_s14 = smov (!%p216_p2), 96  }
   0xb   : > { %v1163_v0 = vld [vmem:[%s1453_s3 + $0x78] sm:$0xff]   ;;  %v1195_v1 = vmov 0.0   ;;  %vm1196_vm0 = vmmov 0   ;;  %v1166_v4 = vld [vmem:[%s1453_s3 + $0x70] sm:$0xff]   ;;  %v1169_v7 = vld [vmem:[%s1453_s3 + $0x68] sm:$0xff]   ;;  %s1458_s22 = smov (!%p249_p3, %s941_s22), 1 }
   0xc   : > { %1048 = vmatprep.subr.bf16.mxu1 %v1195_v1  ;;  %v1164_v2 = vld [vmem:[%s1453_s3 + $0xb8] sm:$0xff]   ;;  %981 = vmatprep.subr.bf16.mxu0 %v1163_v0  ;;  %v1167_v5 = vld [vmem:[%s1453_s3 + $0xb0] sm:$0xff]   ;;  %v1170_v8 = vld [vmem:[%s1453_s3 + $0xa8] sm:$0xff]   ;;  %s979_s9 = sshll.u32 %s1458_s22, 4  ;;  %vm350_vm1 = vcmask 1047552   ;;  %vm343_vm3 = vcmask 1040384  }
   0xd   : > { %v1165_v3 = vld [vmem:[%s1453_s3 + $0x38] sm:$0xff]   ;;  %1064 = vmatprep.mubr.msk.bf16.mxu1 %vm1196_vm0, %v1195_v1  ;;  %1049 = vmatpush3.bf16.msra.mxu1 %v1164_v2  ;;  %v1168_v6 = vld [vmem:[%s1453_s3 + $0x30] sm:$0xff]   ;;  %v1171_v9 = vld [vmem:[%s1453_s3 + $0x28] sm:$0xff]   ;;  %s253_s18 = scalar_lea.vmem %s1450_s0, %s979_s9  ;;  %vm351_vm2 = vsmask.f32 7424  ;;  %s258_s27 = scalar_lea.vmem %s1455_s5, %s979_s9  ;;  %vm673_vm7 = vcmask 64512  }
   0xe   : > { %982 = vmatpush3.bf16.msra.mxu0 %v1165_v3  ;;  %1050 = vmatprep.subr.bf16.mxu1 %v1195_v1  ;;  %v1172_v10 = vld [vmem:[%s1453_s3 + $0x60] sm:$0xff]   ;;  %v1175_v13 = vld [vmem:[%s1453_s3 + $0x58] sm:$0xff]   ;;  %v1178_v16 = vld [vmem:[%s1453_s3 + $0x50] sm:$0xff]   ;;  %vm344_vm4 = vsmask.f32 256  ;;  %s1197_s9 = smov 24  }
   0xf   : > { %983 = vmatprep.subr.bf16.mxu0 %v1166_v4  ;;  %v1173_v11 = vld [vmem:[%s1453_s3 + $0xa0] sm:$0xff]   ;;  %v1176_v14 = vld [vmem:[%s1453_s3 + $0x98] sm:$0xff]   ;;  %v1179_v17 = vld [vmem:[%s1453_s3 + $0x90] sm:$0xff]   ;;  %s1208_s15 = smov 88   ;;  %s1209_s16 = smov 112   ;;  %vm731_vm8 = vcmask 130048  }
  0x10   : > { %v1174_v12 = vld [vmem:[%s1453_s3 + $0x20] sm:$0xff]   ;;  %v1177_v15 = vld [vmem:[%s1453_s3 + $0x18] sm:$0xff]   ;;  %v1180_v18 = vld [vmem:[%s1453_s3 + $0x10] sm:$0xff]   ;;  %s1210_s17 = smov 104   ;;  %vm733_vm9 = vcmask 195584   ;;  %vm735_vm10 = vcmask 261120  }
  0x11   : > { %1051 = vmatpush3.bf16.msra.mxu1 %v1167_v5  ;;  %v1181_v19 = vld [vmem:[%s1453_s3 + $0x48] sm:$0xff]   ;;  %v264_v22 = vld [vmem:[%s253_s18] sm:$0xff]  ;;  %v597_v35 = vld [vmem:[%s1454_s4 + $0x78] sm:$0xff]  ;;  %vm737_vm11 = vcmask 326656   ;;  %vm739_vm12 = vcmask 392192   ;;  %vm741_vm13 = vcmask 457728  }
  0x12   : > { %984 = vmatpush3.bf16.msra.mxu0 %v1168_v6  ;;  %1052 = vmatprep.subr.bf16.mxu1 %v1195_v1  ;;  %v1182_v20 = vld [vmem:[%s1453_s3 + $0x88] sm:$0xff]   ;;  %v951_v24 = vld [vmem:[%s1451_s1] ss:$0 sm:$0xff]  ;;  %vm352_vm5 = vmand %vm350_vm1, %vm351_vm2  ;;  %vm743_vm14 = vcmask 523264   ;;  %vm745_vm15 = vcmask 588800   ;;  %vm747_vm0 = vcmask 654336  }
  0x13   : > { %985 = vmatprep.subr.bf16.mxu0 %v1169_v7  ;;  %v1183_v21 = vld [vmem:[%s1453_s3 + $0x8] sm:$0xff]   ;;  %v1184_v25 = vld [vmem:[%s1453_s3 + $0x40] sm:$0xff]   ;;  %v273_v26 = vmul.f32 %v951_v24, %v264_v22  ;;  %vm345_vm6 = vmand %vm343_vm3, %vm344_vm4  ;;  %vm749_vm1 = vcmask 719872   ;;  %vm751_vm2 = vcmask 785408   ;;  %vm753_vm4 = vcmask 850944   ;;  %s950_s19 = sshll.u32 %s1458_s22, 1 }
  0x14   : > { %v265_v23 = vld [vmem:[%s253_s18 + $0x8] sm:$0xff]  ;;  %v952_v28 = vld [vmem:[%s1452_s2] ss:$0 sm:$0xff]  ;;  %v596_v45 = vld [vmem:[%s1454_s4 + $0x70] sm:$0xff]  ;;  %s1211_s18 = smov 120   ;;  %s262_s24 = scalar_lea.vmem %s1456_s6, %s950_s19 }
  0x15   : > { %1053 = vmatpush3.bf16.msra.mxu1 %v1170_v8  ;;  %v274_v27 = vmul.f32 %v951_v24, %v265_v23  ;;  %v1185_v29 = vld [vmem:[%s1453_s3 + $0x80] sm:$0xff]   ;;  %v282_v30 = vadd.f32 %v952_v28, %v273_v26  ;;  %v595_v46 = vld [vmem:[%s1454_s4 + $0x68] sm:$0xff]  ;;  %v593_v48 = vld [vmem:[%s1454_s4 + $0x58] sm:$0xff] }
  0x16   : > { %986 = vmatpush3.bf16.msra.mxu0 %v1171_v9  ;;  %1054 = vmatprep.subr.bf16.mxu1 %v1195_v1  ;;  %v1186_v32 = vld [vmem:[%s1453_s3] sm:$0xff]   ;;  %v592_v49 = vld [vmem:[%s1454_s4 + $0x50] sm:$0xff]  ;;  %v591_v50 = vld [vmem:[%s1454_s4 + $0x48] sm:$0xff] }
  0x17   : > { %987 = vmatprep.subr.bf16.mxu0 %v1172_v10  ;;  %v283_v31 = vadd.f32 %v952_v28, %v274_v27  ;;  %v284_v33 = vmax.f32 %v282_v30, 0.0  ;;  %v594_v47 = vld [vmem:[%s1454_s4 + $0x60] sm:$0xff]  ;;  %v589_v52 = vld [vmem:[%s1454_s4 + $0x38] sm:$0xff]  ;;  %v588_v53 = vld [vmem:[%s1454_s4 + $0x30] sm:$0xff] }
  0x18   : > { %v590_v51 = vld [vmem:[%s1454_s4 + $0x40] sm:$0xff]  ;;  %v587_v54 = vld [vmem:[%s1454_s4 + $0x28] sm:$0xff]  ;;  %v585_v56 = vld [vmem:[%s1454_s4 + $0x18] sm:$0xff] }
  0x19   : > { %1055 = vmatpush3.bf16.msra.mxu1 %v1173_v11  ;;  %v285_v34 = vmax.f32 %v283_v31, 0.0  ;;  %v586_v55 = vld [vmem:[%s1454_s4 + $0x20] sm:$0xff]  ;;  %v584_v57 = vld [vmem:[%s1454_s4 + $0x10] sm:$0xff]  ;;  %v583_v58 = vld [vmem:[%s1454_s4 + $0x8] sm:$0xff] }
  0x1a   : > { %988 = vmatpush3.bf16.msra.mxu0 %v1174_v12  ;;  %1056 = vmatprep.subr.bf16.mxu1 %v1195_v1  ;;  %v582_v59 = vld [vmem:[%s1454_s4] sm:$0xff] }
  0x1b   : > { %989 = vmatprep.subr.bf16.mxu0 %v1175_v13  ;;  %v286_v36 = vpack.c.bf16 %v285_v34, %v284_v33 }
  0x1d   : > { %1057 = vmatpush3.bf16.msra.mxu1 %v1176_v14  ;;  %530 = vmatprep.mubr.bf16.mxu0 %v286_v36  ;;  %v336_v37 = vshrl.u32 %v286_v36, 16  ;;  %v339_v38 = vshll.u32 %v286_v36, 16 }
  0x1e   : > { %990 = vmatpush3.bf16.msra.mxu0 %v1177_v15  ;;  %1058 = vmatprep.subr.bf16.mxu1 %v1195_v1 }
  0x1f   : > { %991 = vmatprep.subr.bf16.mxu0 %v1178_v16  ;;  %v347_v39 = vrot.slane %v339_v38, 1  ;;  %v338_v40 = vrot.slane %v336_v37, 7 }
  0x21   : > { %1059 = vmatpush3.bf16.msra.mxu1 %v1179_v17  ;;  %v348_v41 = vor.u32 %v347_v39, %v336_v37  ;;  %v341_v42 = vor.u32 %v339_v38, %v338_v40  ;;  %v759_v39 = vlaneseq }
  0x22   : > { %992 = vmatpush3.bf16.msra.mxu0 %v1180_v18  ;;  %1060 = vmatprep.subr.bf16.mxu1 %v1195_v1 }
  0x23   : > { %993 = vmatprep.subr.bf16.mxu0 %v1181_v19  ;;  %v353_v43 = vsel %vm352_vm5, %v348_v41, 0  ;;  %v346_v44 = vsel %vm345_vm6, 0, %v341_v42  ;;  %vm755_vm5 = vcmask 916480   ;;  %vm757_vm6 = vcmask 982016  }
  0x25   : > { %1061 = vmatpush3.bf16.msra.mxu1 %v1182_v20 }
  0x26   : > { %994 = vmatpush3.bf16.msra.mxu0 %v1183_v21  ;;  %1062 = vmatprep.subr.bf16.mxu1 %v1195_v1 }
  0x27   : > { %995 = vmatprep.subr.bf16.mxu0 %v1184_v25 }
  0x29   : > { %1063 = vmatpush3.bf16.msra.mxu1 %v1185_v29 }
  0x2a   : > { %996 = vmatpush3.bf16.msra.mxu0 %v1186_v32  ;;  %1103 = vmatprep.subr.mxu1 %v597_v35 }
  0x2b   : > { %1068 = vmatprep.subr.mxu0 %v597_v35 }
  0x2c   : > { %1065 = vmatmul.mubr.bf16.vlgmr.msra.gmra.mxu1 %v353_v43 }
  0x2d   : > { %531 = vmatmul.mubr.bf16.vlgmr.msra.gmra.mxu0 %v346_v44  ;;  %1104 = vmatpush3.msra.mxu1 %v597_v35  ;;  %v760_v44 = vshrl.u32 %v759_v39, 7 }
  0x2e   : > { %1069 = vmatpush3.msra.mxu0 %v597_v35  ;;  %1105 = vmatprep.subr.mxu1 %v596_v45 }
  0x2f   : > { %1070 = vmatprep.subr.mxu0 %v596_v45  ;;  %1106 = vmatpush3.msra.mxu1 %v596_v45 }
  0x30   : > { %1071 = vmatpush3.msra.mxu0 %v596_v45  ;;  %1107 = vmatprep.subr.mxu1 %v595_v46 }
  0x31   : > { %1072 = vmatprep.subr.mxu0 %v595_v46  ;;  %1108 = vmatpush3.msra.mxu1 %v595_v46 }
  0x32   : > { %1073 = vmatpush3.msra.mxu0 %v595_v46  ;;  %1109 = vmatprep.subr.mxu1 %v594_v47 }
  0x33   : > { %1074 = vmatprep.subr.mxu0 %v594_v47  ;;  %1110 = vmatpush3.msra.mxu1 %v594_v47 }
  0x34   : > { %1075 = vmatpush3.msra.mxu0 %v594_v47  ;;  %1111 = vmatprep.subr.mxu1 %v593_v48 }
  0x35   : > { %1076 = vmatprep.subr.mxu0 %v593_v48  ;;  %1112 = vmatpush3.msra.mxu1 %v593_v48 }
  0x36   : > { %1077 = vmatpush3.msra.mxu0 %v593_v48  ;;  %1113 = vmatprep.subr.mxu1 %v592_v49 }
  0x37   : > { %1078 = vmatprep.subr.mxu0 %v592_v49  ;;  %1114 = vmatpush3.msra.mxu1 %v592_v49 }
  0x38   : > { %1079 = vmatpush3.msra.mxu0 %v592_v49  ;;  %1115 = vmatprep.subr.mxu1 %v591_v50  ;;  %v761_v49 = vsub.s32 0, %v760_v44 }
  0x39   : > { %1080 = vmatprep.subr.mxu0 %v591_v50  ;;  %1116 = vmatpush3.msra.mxu1 %v591_v50 }
  0x3a   : > { %1081 = vmatpush3.msra.mxu0 %v591_v50  ;;  %1117 = vmatprep.subr.mxu1 %v590_v51 }
  0x3b   : > { %1082 = vmatprep.subr.mxu0 %v590_v51  ;;  %1118 = vmatpush3.msra.mxu1 %v590_v51 }
  0x3c   : > { %1083 = vmatpush3.msra.mxu0 %v590_v51  ;;  %1119 = vmatprep.subr.mxu1 %v589_v52 }
  0x3d   : > { %1084 = vmatprep.subr.mxu0 %v589_v52  ;;  %1120 = vmatpush3.msra.mxu1 %v589_v52 }
  0x3e   : > { %1085 = vmatpush3.msra.mxu0 %v589_v52  ;;  %1121 = vmatprep.subr.mxu1 %v588_v53 }
  0x3f   : > { %1086 = vmatprep.subr.mxu0 %v588_v53  ;;  %1122 = vmatpush3.msra.mxu1 %v588_v53 }
  0x40   : > { %1087 = vmatpush3.msra.mxu0 %v588_v53  ;;  %1123 = vmatprep.subr.mxu1 %v587_v54 }
  0x41   : > { %1088 = vmatprep.subr.mxu0 %v587_v54  ;;  %1124 = vmatpush3.msra.mxu1 %v587_v54 }
  0x42   : > { %1089 = vmatpush3.msra.mxu0 %v587_v54  ;;  %1125 = vmatprep.subr.mxu1 %v586_v55 }
  0x43   : > { %1090 = vmatprep.subr.mxu0 %v586_v55  ;;  %1126 = vmatpush3.msra.mxu1 %v586_v55 }
  0x44   : > { %1091 = vmatpush3.msra.mxu0 %v586_v55  ;;  %1127 = vmatprep.subr.mxu1 %v585_v56 }
  0x45   : > { %1092 = vmatprep.subr.mxu0 %v585_v56  ;;  %1128 = vmatpush3.msra.mxu1 %v585_v56 }
  0x46   : > { %1093 = vmatpush3.msra.mxu0 %v585_v56  ;;  %1129 = vmatprep.subr.mxu1 %v584_v57 }
  0x47   : > { %1094 = vmatprep.subr.mxu0 %v584_v57  ;;  %1130 = vmatpush3.msra.mxu1 %v584_v57 }
  0x48   : > { %1095 = vmatpush3.msra.mxu0 %v584_v57  ;;  %1131 = vmatprep.subr.mxu1 %v583_v58 }
  0x49   : > { %1096 = vmatprep.subr.mxu0 %v583_v58  ;;  %1132 = vmatpush3.msra.mxu1 %v583_v58 }
  0x4a   : > { %1097 = vmatpush3.msra.mxu0 %v583_v58  ;;  %1133 = vmatprep.subr.mxu1 %v582_v59 }
  0x4b   : > { %1098 = vmatprep.subr.mxu0 %v582_v59  ;;  %1134 = vmatpush3.msra.mxu1 %v582_v59 }
  0x4c   : > { %1099 = vmatpush3.msra.mxu0 %v582_v59 }
  0xec   : > { %v573_v60 = vpop.f32.mrf.mxu1 }
  0xed   : > { %v997_v61 = vpop.f32.mrf.mxu0 }
  0xee   : > { %v1066_v62 = vpop.f32.mrf.mxu1 }
  0xef   : > { %v998_v63 = vpop.f32.mrf.mxu0 }
  0xf0   : > { %v999_v0 = vadd.f32 %v998_v63, %v997_v61  ;;  %v576_v1 = vpop.f32.mrf.mxu1 }
  0xf1   : > { %v1000_v2 = vpop.f32.mrf.mxu0 }
  0xf2   : > { %v1408_v3 = vadd.f32 %v999_v0, %v573_v60  ;;  %v1067_v4 = vpop.f32.mrf.mxu1 }
  0xf3   : > { %v1001_v5 = vpop.f32.mrf.mxu0 }
  0xf4   : > { %580 = vst [vmem:[%s258_s27] sm:$0xff] %v1408_v3  ;;  %v1002_v6 = vadd.f32 %v1001_v5, %v1000_v2  ;;  %1100 = vmatprep.mubr.f32.mxu0 %v1408_v3 }
  0xf6   : > { %v1412_v7 = vadd.f32 %v1002_v6, %v576_v1 }
  0xf8   : > { %581 = vst [vmem:[%s258_s27 + $0x8] sm:$0xff] %v1412_v7  ;;  %1101 = vmatmul.mubr.f32.vlgmr.msra.gmra.mxu0 %v1412_v7 }
 0x1b8   : > { %v1102_v8 = vpop.f32.mrf.mxu0 }
 0x1b9   : > { %v675_v10 = vsel %vm673_vm7, %v1102_v8, 0.0 }
 0x1ba   : > { %v664_v9 = vpop.f32.mrf.mxu0 }
 0x1bb   : > { %v674_v11 = vsel %vm673_vm7, %v664_v9, 0.0 }
 0x1bc   : > { %v676_v12 = vadd.f32 %v675_v10, %v674_v11 }
 0x1be   : > { %v677_v13 = vrot.slane %v676_v12, 4 }
 0x1c0   : > { %v678_v14 = vadd.f32 %v677_v13, %v676_v12 }
 0x1c2   : > { %v679_v15 = vrot.slane %v678_v14, 2 }
 0x1c4   : > { %v680_v16 = vadd.f32 %v679_v15, %v678_v14 }
 0x1c6   : > { %v681_v17 = vrot.slane %v680_v16, 1 }
 0x1c8   : > { %v682_v18 = vadd.f32 %v681_v17, %v680_v16 }
 0x1ca   : > { %v1418_v19 = vmul.f32 0.00390625, %v682_v18 }
 0x1cc   : > { %691 = vrot.lane.b32.xlu1 %v1418_v19, %s1197_s9  ;;  %685 = vrot.lane.b32.xlu0 %v1418_v19, %s1198_s28 }
 0x1d0   : > { %694 = vrot.lane.b32.xlu1 %v1418_v19, %s1199_s29  ;;  %688 = vrot.lane.b32.xlu0 %v1418_v19, %s1200_s30 }
 0x1d4   : > { %700 = vrot.lane.b32.xlu1 %v1418_v19, %s1201_s7  ;;  %697 = vrot.lane.b32.xlu0 %v1418_v19, %s1202_s8 }
 0x1d8   : > { %706 = vrot.lane.b32.xlu1 %v1418_v19, %s1203_s10  ;;  %703 = vrot.lane.b32.xlu0 %v1418_v19, %s1204_s11 }
 0x1dc   : > { %712 = vrot.lane.b32.xlu1 %v1418_v19, %s1205_s12  ;;  %709 = vrot.lane.b32.xlu0 %v1418_v19, %s1206_s13 }
 0x1e0   : > { %718 = vrot.lane.b32.xlu1 %v1418_v19, %s1207_s14  ;;  %715 = vrot.lane.b32.xlu0 %v1418_v19, %s1208_s15 }
 0x1e4   : > { %724 = vrot.lane.b32.xlu1 %v1418_v19, %s1209_s16  ;;  %721 = vrot.lane.b32.xlu0 %v1418_v19, %s1210_s17 }
 0x1e8   : > { %727 = vrot.lane.b32.xlu0 %v1418_v19, %s1211_s18 }
 0x23e   : > { %v692_v20 = vpop.permute.xlu1 %691  ;;  %v686_v21 = vpop.permute.xlu0 %685 }
 0x23f   : > { %v730_v22 = vsel %vm673_vm7, %v1418_v19, %v686_v21 }
 0x242   : > { %v695_v23 = vpop.permute.xlu1 %694  ;;  %v689_v24 = vpop.permute.xlu0 %688 }
 0x243   : > { %v732_v25 = vsel %vm731_vm8, %v730_v22, %v689_v24  ;;  %vm853_vm8 = vcmask 58368  }
 0x244   : > { %v734_v26 = vsel %vm733_vm9, %v732_v25, %v692_v20 }
 0x245   : > { %v736_v27 = vsel %vm735_vm10, %v734_v26, %v695_v23 }
 0x246   : > { %v701_v28 = vpop.permute.xlu1 %700  ;;  %v698_v29 = vpop.permute.xlu0 %697 }
 0x247   : > { %v738_v30 = vsel %vm737_vm11, %v736_v27, %v698_v29 }
 0x248   : > { %v740_v32 = vsel %vm739_vm12, %v738_v30, %v701_v28 }
 0x24a   : > { %v707_v31 = vpop.permute.xlu1 %706  ;;  %v704_v33 = vpop.permute.xlu0 %703 }
 0x24b   : > { %v742_v34 = vsel %vm741_vm13, %v740_v32, %v704_v33 }
 0x24c   : > { %v744_v36 = vsel %vm743_vm14, %v742_v34, %v707_v31 }
 0x24e   : > { %v713_v35 = vpop.permute.xlu1 %712  ;;  %v710_v37 = vpop.permute.xlu0 %709 }
 0x24f   : > { %v746_v38 = vsel %vm745_vm15, %v744_v36, %v710_v37 }
 0x250   : > { %v748_v41 = vsel %vm747_vm0, %v746_v38, %v713_v35 }
 0x252   : > { %v719_v40 = vpop.permute.xlu1 %718  ;;  %v716_v42 = vpop.permute.xlu0 %715 }
 0x253   : > { %v750_v43 = vsel %vm749_vm1, %v748_v41, %v716_v42 }
 0x254   : > { %v752_v45 = vsel %vm751_vm2, %v750_v43, %v719_v40 }
 0x256   : > { %v722_v46 = vpop.permute.xlu0 %721  ;;  %v725_v47 = vpop.permute.xlu1 %724 }
 0x257   : > { %v754_v48 = vsel %vm753_vm4, %v752_v45, %v722_v46 }
 0x258   : > { %v756_v50 = vsel %vm755_vm5, %v754_v48, %v725_v47 }
 0x25a   : > { %v728_v51 = vpop.permute.xlu0 %727 }
 0x25b   : > { %v758_v52 = vsel %vm757_vm6, %v756_v50, %v728_v51 }
 0x25c   : > { %v762_v53 = vrot.slane %v758_v52, %v761_v49 }
 0x25e   : > { %v764_v54 = vsub.f32 %v1412_v7, %v762_v53  ;;  %v763_v55 = vsub.f32 %v1408_v3, %v762_v53 }
 0x260   : > { %v766_v56 = vmul.f32 %v764_v54, %v764_v54  ;;  %v765_v57 = vmul.f32 %v763_v55, %v763_v55 }
 0x262   : > { %1135 = vmatprep.mubr.f32.mxu1 %v765_v57 }
 0x263   : > { %1136 = vmatmul.mubr.f32.vlgmr.msra.gmra.mxu1 %v766_v56 }
 0x323   : > { %v1137_v58 = vpop.f32.mrf.mxu1 }
 0x324   : > { %v843_v60 = vsel %vm673_vm7, %v1137_v58, 0.0 }
 0x325   : > { %v833_v59 = vpop.f32.mrf.mxu1 }
 0x326   : > { %v842_v61 = vsel %vm673_vm7, %v833_v59, 0.0 }
 0x327   : > { %v844_v62 = vadd.f32 %v843_v60, %v842_v61 }
 0x329   : > { %v845_v63 = vrot.slane %v844_v62, 4 }
 0x32b   : > { %v846_v0 = vadd.f32 %v845_v63, %v844_v62 }
 0x32d   : > { %v847_v1 = vrot.slane %v846_v0, 2 }
 0x32f   : > { %v848_v2 = vadd.f32 %v847_v1, %v846_v0 }
 0x331   : > { %v849_v4 = vrot.slane %v848_v2, 1 }
 0x333   : > { %v850_v3 = vadd.f32 %v849_v4, %v848_v2 }
 0x335   : > { %v852_v5 = vsel %vm343_vm3, %v1418_v19, %v850_v3 }
 0x336   : > { %854 = vst.msk [vmem:[%s262_s24] sm:$0x3] %vm853_vm8, %v852_v5 }
 0x337 PF: > { %s17_s21 = sadd.s32 1, %s1193_s21  }
 0x338   : > { %p14_p4 = scmp.ge.s32.totalorder %s17_s21, 4  }
 0x33a   :  { %16 = sbr.rel (!%p14_p4) target bundleno = 1 (0x1), region = 82 }

// kernel: up_forward.3
= control target key start
LH: loop header
LB: loop body
LE: loop exit
PB: predicated region body
PF: predicated region fallthrough
CT: control target
= control target key end

     0   :  { %s1500_s27 = smov 0   ;;  %s1768_s0 = inlined_call_operand.vmem [shape: f32[2,8,32], index: 0, kind: input, shape index: {}]   ;;  %s1769_s1 = inlined_call_operand.vmem [shape: f32[2,16,64], index: 1, kind: input, shape index: {}]   ;;  %s1770_s2 = inlined_call_operand.vmem [shape: f32[16,8], index: 2, kind: input, shape index: {}]   ;;  %s1771_s3 = inlined_call_operand.vmem [shape: f32[32,64], index: 3, kind: input, shape index: {}]   ;;  %s1772_s4 = inlined_call_operand.vmem [shape: bf16[192,128], index: 4, kind: input, shape index: {}]   ;;  %s1773_s5 = inlined_call_operand.vmem [shape: bf16[192,128], index: 5, kind: input, shape index: {}]   ;;  %s1774_s6 = inlined_call_operand.vmem [shape: f32[128,8], index: 6, kind: input, shape index: {}]   ;;  %s1775_s7 = inlined_call_operand.vmem [shape: f32[2,16,128], index: 7, kind: output, shape index: {0}]   ;;  %s1776_s8 = inlined_call_operand.vmem [shape: f32[2,2,8], index: 8, kind: output, shape index: {1}]  }
   0x1 LB: > { %s1207_s28 = sadd.s32 4294967295, %s1437_s27   ;;  %p1211_p0 = scmp.ge.s32.totalorder %s1437_s27, 1  ;;  %s1437_s27 = sphi %s1500_s27, %s19_s27  }
   0x2   : > { %p274_p1 = scmp.lt.s32.totalorder %s1437_s27, 3 }
   0x4   : > { %p275_p2 = pnand %p1211_p0, %p274_p1 }
   0x5   : > { %p316_p3 = scmp.lt.s32.totalorder (!%p275_p2), %s1207_s28, 1  ;;  %s1439_s29 = smov (!%p275_p2), 64  }
   0x6   : > { %278 = sbr.rel (%p275_p2) target bundleno = 1301 (0x515), region = 48  ;;  %s1442_s19 = smov (!%p275_p2), 8  }
   0x7   : > { %s1443_s20 = smov (!%p275_p2), 40   ;;  %s1444_s21 = smov (!%p275_p2), 16  }
   0x8   : > { %s1445_s22 = smov (!%p275_p2), 56   ;;  %s1446_s24 = smov (!%p275_p2), 32  }
   0x9   : > { %s1447_s25 = smov (!%p275_p2), 72   ;;  %s1449_s30 = smov (!%p275_p2), 88  }
   0xa   : > { %s1450_s9 = smov (!%p275_p2), 104   ;;  %s1451_s10 = smov (!%p275_p2), 80  }
   0xb   : > { %v335_v0 = vld [vmem:[%s1770_s2] sm:$0xff]  ;;  %vm338_vm0 = vcmask 64512   ;;  %v423_v1 = vld [vmem:[%s1771_s3 + $0x18] sm:$0xff]  ;;  %v422_v2 = vld [vmem:[%s1771_s3 + $0x10] sm:$0xff]  ;;  %s1782_s28 = smov (!%p316_p3, %s1207_s28), 1  ;;  %vm424_vm1 = vcmask 261120  }
   0xc   : > { %1299 = vmatprep.mubr.msk.f32.mxu0 %vm338_vm0, %v335_v0  ;;  %1302 = vmatprep.subr.mxu1 %v423_v1  ;;  %s1212_s13 = sshll.u32 %s1782_s28, 3  ;;  %v336_v3 = vld [vmem:[%s1770_s2 + $0x8] sm:$0xff]  ;;  %v420_v6 = vld [vmem:[%s1771_s3] sm:$0xff]  ;;  %s1250_s23 = sshll.u32 %s1782_s28, 4  ;;  %v1407_v12 = vld [vmem:[%s1772_s4 + $0x38] sm:$0xff]   ;;  %v1440_v14 = vmov 0  }
   0xd   : > { %1303 = vmatpush3.msra.mxu1 %v423_v1  ;;  %s319_s18 = scalar_lea.vmem %s1768_s0, %s1212_s13  ;;  %v421_v5 = vld [vmem:[%s1771_s3 + $0x8] sm:$0xff]  ;;  %s324_s26 = scalar_lea.vmem %s1769_s1, %s1250_s23  ;;  %v1410_v15 = vld [vmem:[%s1773_s5 + $0x38] sm:$0xff]   ;;  %vm548_vm2 = vcmask 1047552   ;;  %vm549_vm3 = vsmask.f32 7424  ;;  %v1408_v17 = vld [vmem:[%s1772_s4 + $0x30] sm:$0xff]  }
   0xe   : > { %1304 = vmatprep.subr.mxu1 %v422_v2  ;;  %v337_v4 = vld [vmem:[%s319_s18] sm:$0xff]  ;;  %v507_v8 = vld [vmem:[%s324_s26 + $0x8] sm:$0xff]  ;;  %v1412_v19 = vld [vmem:[%s1773_s5 + $0x30] sm:$0xff]   ;;  %vm555_vm5 = vcmask 523264   ;;  %vm541_vm6 = vcmask 1040384   ;;  %s329_s18 = scalar_lea.vmem %s1775_s7, %s1250_s23  ;;  %s1441_s23 = smov 24  }
   0xf   : > { %1305 = vmatpush3.msra.mxu1 %v422_v2  ;;  %1297 = vmatprep.subr.mxu0 %v337_v4  ;;  %v506_v7 = vld [vmem:[%s324_s26] sm:$0xff]  ;;  %vm1566_vm4 = vmand %vm548_vm2, %vm549_vm3  ;;  %v1409_v22 = vld [vmem:[%s1772_s4 + $0x28] sm:$0xff]   ;;  %vm542_vm7 = vsmask.f32 256  ;;  %s1448_s26 = smov 48   ;;  %s1452_s11 = smov 120  }
  0x10   : > { %1298 = vmatpush3.msra.mxu0 %v337_v4  ;;  %1306 = vmatprep.subr.mxu1 %v421_v5  ;;  %v1540_v9 = vpack.c.bf16 %v507_v8, %v506_v7  ;;  %v1414_v24 = vld [vmem:[%s1773_s5 + $0x28] sm:$0xff]   ;;  %v1411_v25 = vld [vmem:[%s1772_s4 + $0x20] sm:$0xff]   ;;  %v1413_v27 = vld [vmem:[%s1772_s4 + $0x18] sm:$0xff]   ;;  %s1453_s12 = smov 96   ;;  %s1454_s13 = smov 112   ;;  %vm987_vm9 = vcmask 130048  }
  0x11   : > { %1300 = vmatmul.mubr.msk.f32.vlgmr.msra.gmra.mxu0 %vm338_vm0, %v336_v3  ;;  %1307 = vmatpush3.msra.mxu1 %v421_v5  ;;  %v1416_v26 = vld [vmem:[%s1773_s5 + $0x20] sm:$0xff]   ;;  %v1418_v28 = vld [vmem:[%s1773_s5 + $0x18] sm:$0xff]   ;;  %v1415_v29 = vld [vmem:[%s1772_s4 + $0x10] sm:$0xff]   ;;  %vm989_vm10 = vcmask 195584   ;;  %vm992_vm11 = vcmask 326656   ;;  %vm994_vm12 = vcmask 392192  }
  0x12   : > { %1308 = vmatprep.subr.mxu1 %v420_v6  ;;  %553 = vrot.lane.b32.xlu0 %v1540_v9, %s1439_s29  ;;  %v537_v13 = vshll.u32 %v1540_v9, 16  ;;  %v534_v16 = vshrl.u32 %v1540_v9, 16  ;;  %v1420_v30 = vld [vmem:[%s1773_s5 + $0x10] sm:$0xff]   ;;  %v1417_v31 = vld [vmem:[%s1772_s4 + $0x8] sm:$0xff]   ;;  %v1419_v33 = vld [vmem:[%s1772_s4] sm:$0xff]   ;;  %vm996_vm13 = vcmask 457728  }
  0x13   : > { %1309 = vmatpush3.msra.mxu1 %v420_v6  ;;  %680 = vmatprep.subr.bf16.mxu0 %v1440_v14  ;;  %v1422_v32 = vld [vmem:[%s1773_s5 + $0x8] sm:$0xff]   ;;  %v1424_v34 = vld [vmem:[%s1773_s5] sm:$0xff]   ;;  %v1421_v35 = vld [vmem:[%s1772_s4 + $0x58] sm:$0xff]   ;;  %vm999_vm14 = vcmask 588800   ;;  %vm1001_vm15 = vcmask 654336   ;;  %vm1003_vm2 = vcmask 719872  }
  0x14   : > { %796 = vmatprep.subr.bf16.mxu1 %v1440_v14  ;;  %v545_v18 = vrot.slane %v537_v13, 1  ;;  %681 = vmatpush1.bf16.msra.mxu0 %v1410_v15  ;;  %v1426_v36 = vld [vmem:[%s1773_s5 + $0x58] sm:$0xff]   ;;  %v1423_v37 = vld [vmem:[%s1772_s4 + $0x50] sm:$0xff]   ;;  %v536_v38 = vrot.slane %v534_v16, 7  ;;  %v1425_v40 = vld [vmem:[%s1772_s4 + $0x48] sm:$0xff]   ;;  %vm1007_vm3 = vcmask 850944  }
  0x15   : > { %682 = vmatprep.subr.bf16.mxu0 %v1440_v14  ;;  %v1428_v39 = vld [vmem:[%s1773_s5 + $0x50] sm:$0xff]   ;;  %v1429_v42 = vld [vmem:[%s1773_s5 + $0x48] sm:$0xff]   ;;  %v1427_v43 = vld [vmem:[%s1772_s4 + $0x40] sm:$0xff]  }
  0x16   : > { %v546_v20 = vor.u32 %v545_v18, %v534_v16  ;;  %v539_v41 = vor.u32 %v537_v13, %v536_v38  ;;  %vm1651_vm8 = vmand %vm541_vm6, %vm542_vm7  ;;  %v1430_v47 = vld [vmem:[%s1773_s5 + $0x40] sm:$0xff]   ;;  %v854_v49 = vld [vmem:[%s1774_s6 + $0x78] sm:$0xff]  ;;  %vm1011_vm7 = vcmask 982016  }
  0x17   : > { %v853_v50 = vld [vmem:[%s1774_s6 + $0x70] sm:$0xff]  ;;  %v852_v51 = vld [vmem:[%s1774_s6 + $0x68] sm:$0xff]  ;;  %v851_v52 = vld [vmem:[%s1774_s6 + $0x60] sm:$0xff] }
  0x18   : > { %v551_v23 = vsel %vm1566_vm4, %v546_v20, 0  ;;  %683 = vmatpush1.bf16.msra.mxu0 %v1412_v19  ;;  %v544_v46 = vsel %vm1651_vm8, 0, %v539_v41  ;;  %v850_v54 = vld [vmem:[%s1774_s6 + $0x58] sm:$0xff]  ;;  %v849_v57 = vld [vmem:[%s1774_s6 + $0x50] sm:$0xff]  ;;  %v848_v60 = vld [vmem:[%s1774_s6 + $0x48] sm:$0xff] }
  0x19   : > { %684 = vmatprep.subr.bf16.mxu0 %v1440_v14  ;;  %v847_v63 = vld [vmem:[%s1774_s6 + $0x40] sm:$0xff]  ;;  %v846_v2 = vld [vmem:[%s1774_s6 + $0x38] sm:$0xff]  ;;  %v845_v4 = vld [vmem:[%s1774_s6 + $0x30] sm:$0xff] }
  0x1a   : > { %v844_v5 = vld [vmem:[%s1774_s6 + $0x28] sm:$0xff]  ;;  %v843_v6 = vld [vmem:[%s1774_s6 + $0x20] sm:$0xff]  ;;  %v842_v7 = vld [vmem:[%s1774_s6 + $0x18] sm:$0xff] }
  0x1b   : > { %v841_v15 = vld [vmem:[%s1774_s6 + $0x10] sm:$0xff]  ;;  %v840_v16 = vld [vmem:[%s1774_s6 + $0x8] sm:$0xff] }
  0x1c   : > { %685 = vmatpush1.bf16.msra.mxu0 %v1414_v24 }
  0x1d   : > { %686 = vmatprep.subr.bf16.mxu0 %v1440_v14 }
  0x20   : > { %687 = vmatpush1.bf16.msra.mxu0 %v1416_v26 }
  0x21   : > { %688 = vmatprep.subr.bf16.mxu0 %v1440_v14 }
  0x24   : > { %689 = vmatpush1.bf16.msra.mxu0 %v1418_v28 }
  0x25   : > { %690 = vmatprep.subr.bf16.mxu0 %v1440_v14 }
  0x28   : > { %691 = vmatpush1.bf16.msra.mxu0 %v1420_v30 }
  0x29   : > { %692 = vmatprep.subr.bf16.mxu0 %v1440_v14 }
  0x2c   : > { %693 = vmatpush1.bf16.msra.mxu0 %v1422_v32 }
  0x2d   : > { %694 = vmatprep.subr.bf16.mxu0 %v1440_v14 }
  0x30   : > { %695 = vmatpush1.bf16.msra.mxu0 %v1424_v34 }
  0x31   : > { %704 = vmatprep.subr.bf16.mxu0 %v1440_v14 }
  0x34   : > { %705 = vmatpush2.bf16.msra.mxu0 %v1426_v36 }
  0x35   : > { %706 = vmatprep.subr.bf16.mxu0 %v1440_v14 }
  0x38   : > { %707 = vmatpush2.bf16.msra.mxu0 %v1428_v39 }
  0x39   : > { %708 = vmatprep.subr.bf16.mxu0 %v1440_v14 }
  0x3c   : > { %709 = vmatpush2.bf16.msra.mxu0 %v1429_v42 }
  0x3d   : > { %710 = vmatprep.subr.bf16.mxu0 %v1440_v14 }
  0x40   : > { %711 = vmatpush2.bf16.msra.mxu0 %v1430_v47 }
  0x41   : > { %1313 = vmatprep.subr.mxu0 %v854_v49 }
  0x84   : > { %v554_v45 = vpop.permute.xlu0 %553 }
  0x85   : > { %v558_v48 = vsel %vm555_vm5, %v544_v46, %v554_v45 }
  0xd1   : > { %v1301_v10 = vpop.f32.mrf.mxu0 }
  0xd3   : > { %v411_v11 = vpop.f32.mrf.mxu0 }
  0xd4   : > { %1310 = vmatprep.mubr.msk.f32.mxu1 %vm424_vm1, %v411_v11 }
  0xd5   : > { %1311 = vmatmul.mubr.msk.f32.vlgmr.msra.gmra.mxu1 %vm424_vm1, %v1301_v10 }
  0xd6   : > { %797 = vmatpush1.bf16.msra.mxu1 %v1407_v12  ;;  %1247 = vmatprep.mubr.msk.bf16.mxu1 %vm555_vm5, %v551_v23 }
  0xd7   : > { %798 = vmatprep.subr.bf16.mxu1 %v1440_v14 }
  0xda   : > { %799 = vmatpush1.bf16.msra.mxu1 %v1408_v17  ;;  %v839_v17 = vld [vmem:[%s1774_s6] sm:$0xff] }
  0xdb   : > { %800 = vmatprep.subr.bf16.mxu1 %v1440_v14 }
  0xde   : > { %801 = vmatpush1.bf16.msra.mxu1 %v1409_v22 }
  0xdf   : > { %802 = vmatprep.subr.bf16.mxu1 %v1440_v14 }
  0xe2   : > { %803 = vmatpush1.bf16.msra.mxu1 %v1411_v25 }
  0xe3   : > { %804 = vmatprep.subr.bf16.mxu1 %v1440_v14 }
  0xe6   : > { %805 = vmatpush1.bf16.msra.mxu1 %v1413_v27 }
  0xe7   : > { %806 = vmatprep.subr.bf16.mxu1 %v1440_v14 }
  0xea   : > { %807 = vmatpush1.bf16.msra.mxu1 %v1415_v29 }
  0xeb   : > { %808 = vmatprep.subr.bf16.mxu1 %v1440_v14 }
  0xee   : > { %809 = vmatpush1.bf16.msra.mxu1 %v1417_v31 }
  0xef   : > { %810 = vmatprep.subr.bf16.mxu1 %v1440_v14 }
  0xf2   : > { %811 = vmatpush1.bf16.msra.mxu1 %v1419_v33 }
  0xf3   : > { %820 = vmatprep.subr.bf16.mxu1 %v1440_v14 }
  0xf6   : > { %821 = vmatpush2.bf16.msra.mxu1 %v1421_v35 }
  0xf7   : > { %822 = vmatprep.subr.bf16.mxu1 %v1440_v14 }
  0xfa   : > { %823 = vmatpush2.bf16.msra.mxu1 %v1423_v37 }
  0xfb   : > { %824 = vmatprep.subr.bf16.mxu1 %v1440_v14 }
  0xfe   : > { %825 = vmatpush2.bf16.msra.mxu1 %v1425_v40 }
  0xff   : > { %826 = vmatprep.subr.bf16.mxu1 %v1440_v14 }
 0x102   : > { %827 = vmatpush2.bf16.msra.mxu1 %v1427_v43 }
 0x103   : > { %1348 = vmatprep.subr.mxu1 %v854_v49 }
 0x105   : > { %829 = vmatmul.mubr.bf16.vlgmr.msra.gmra.mxu1 %v558_v48 }
 0x106   : > { %1349 = vmatpush3.msra.mxu1 %v854_v49 }
 0x107   : > { %1350 = vmatprep.subr.mxu1 %v853_v50 }
 0x108   : > { %1351 = vmatpush3.msra.mxu1 %v853_v50 }
 0x109   : > { %1352 = vmatprep.subr.mxu1 %v852_v51 }
 0x10a   : > { %1353 = vmatpush3.msra.mxu1 %v852_v51 }
 0x10b   : > { %1354 = vmatprep.subr.mxu1 %v851_v52 }
 0x10c   : > { %1355 = vmatpush3.msra.mxu1 %v851_v52 }
 0x10d   : > { %1356 = vmatprep.subr.mxu1 %v850_v54 }
 0x10e   : > { %1357 = vmatpush3.msra.mxu1 %v850_v54 }
 0x10f   : > { %1358 = vmatprep.subr.mxu1 %v849_v57 }
 0x110   : > { %1359 = vmatpush3.msra.mxu1 %v849_v57 }
 0x111   : > { %1360 = vmatprep.subr.mxu1 %v848_v60 }
 0x112   : > { %1361 = vmatpush3.msra.mxu1 %v848_v60 }
 0x113   : > { %1362 = vmatprep.subr.mxu1 %v847_v63 }
 0x114   : > { %1363 = vmatpush3.msra.mxu1 %v847_v63 }
 0x115   : > { %1364 = vmatprep.subr.mxu1 %v846_v2 }
 0x116   : > { %1365 = vmatpush3.msra.mxu1 %v846_v2 }
 0x117   : > { %1366 = vmatprep.subr.mxu1 %v845_v4 }
 0x118   : > { %1367 = vmatpush3.msra.mxu1 %v845_v4 }
 0x119   : > { %1368 = vmatprep.subr.mxu1 %v844_v5 }
 0x11a   : > { %1369 = vmatpush3.msra.mxu1 %v844_v5 }
 0x11b   : > { %1370 = vmatprep.subr.mxu1 %v843_v6 }
 0x11c   : > { %1371 = vmatpush3.msra.mxu1 %v843_v6 }
 0x11d   : > { %1372 = vmatprep.subr.mxu1 %v842_v7 }
 0x11e   : > { %1373 = vmatpush3.msra.mxu1 %v842_v7 }
 0x11f   : > { %1374 = vmatprep.subr.mxu1 %v841_v15 }
 0x120   : > { %1375 = vmatpush3.msra.mxu1 %v841_v15 }
 0x121   : > { %1376 = vmatprep.subr.mxu1 %v840_v16 }
 0x122   : > { %1377 = vmatpush3.msra.mxu1 %v840_v16 }
 0x123   : > { %1378 = vmatprep.subr.mxu1 %v839_v17 }
 0x124   : > { %1379 = vmatpush3.msra.mxu1 %v839_v17 }
 0x195   : > { %v1312_v53 = vpop.f32.mrf.mxu1 }
 0x197   : > { %v497_v55 = vpop.f32.mrf.mxu1 }
 0x198   : > { %v560_v56 = vpack.c.bf16 %v1312_v53, %v497_v55 }
 0x19a   : > { %v586_v58 = vshrl.u32 %v560_v56, 16  ;;  %v589_v59 = vshll.u32 %v560_v56, 16  ;;  %599 = vrot.lane.b32.xlu0 %v560_v56, %s1439_s29 }
 0x19c   : > { %v588_v61 = vrot.slane %v586_v58, 7  ;;  %v594_v62 = vrot.slane %v589_v59, 1 }
 0x19e   : > { %v595_v0 = vor.u32 %v594_v62, %v586_v58  ;;  %v591_v1 = vor.u32 %v589_v59, %v588_v61 }
 0x1a0   : > { %v597_v3 = vsel %vm1566_vm4, %v595_v0, 0  ;;  %v593_v9 = vsel %vm1651_vm8, 0, %v591_v1  ;;  %vm1009_vm4 = vcmask 916480  }
 0x1a1   : > { %1234 = vmatprep.mubr.msk.bf16.mxu0 %vm555_vm5, %v597_v3 }
 0x1c5   : > { %v830_v11 = vpop.f32.mrf.mxu1 }
 0x1c7   : > { %v832_v12 = vpop.f32.mrf.mxu1 }
 0x1c9   : > { %v833_v13 = vpop.f32.mrf.mxu1 }
 0x1cb   : > { %v835_v14 = vpop.f32.mrf.mxu1 }
 0x20c   : > { %v600_v8 = vpop.permute.xlu0 %599 }
 0x20d   : > { %v603_v10 = vsel %vm555_vm5, %v593_v9, %v600_v8 }
 0x20e   : > { %713 = vmatmul.mubr.bf16.vlgmr.msra.gmra.mxu0 %v603_v10 }
 0x20f   : > { %1314 = vmatpush3.msra.mxu0 %v854_v49 }
 0x210   : > { %1315 = vmatprep.subr.mxu0 %v853_v50 }
 0x211   : > { %1316 = vmatpush3.msra.mxu0 %v853_v50 }
 0x212   : > { %1317 = vmatprep.subr.mxu0 %v852_v51 }
 0x213   : > { %1318 = vmatpush3.msra.mxu0 %v852_v51 }
 0x214   : > { %1319 = vmatprep.subr.mxu0 %v851_v52 }
 0x215   : > { %1320 = vmatpush3.msra.mxu0 %v851_v52 }
 0x216   : > { %1321 = vmatprep.subr.mxu0 %v850_v54 }
 0x217   : > { %1322 = vmatpush3.msra.mxu0 %v850_v54  ;;  %v1013_v54 = vlaneseq }
 0x218   : > { %1323 = vmatprep.subr.mxu0 %v849_v57 }
 0x219   : > { %1324 = vmatpush3.msra.mxu0 %v849_v57  ;;  %v1014_v59 = vshrl.u32 %v1013_v54, 7 }
 0x21a   : > { %1325 = vmatprep.subr.mxu0 %v848_v60 }
 0x21b   : > { %1326 = vmatpush3.msra.mxu0 %v848_v60 }
 0x21c   : > { %1327 = vmatprep.subr.mxu0 %v847_v63 }
 0x21d   : > { %1328 = vmatpush3.msra.mxu0 %v847_v63  ;;  %v1015_v63 = vsub.s32 0, %v1014_v59 }
 0x21e   : > { %1329 = vmatprep.subr.mxu0 %v846_v2 }
 0x21f   : > { %1330 = vmatpush3.msra.mxu0 %v846_v2 }
 0x220   : > { %1331 = vmatprep.subr.mxu0 %v845_v4 }
 0x221   : > { %1332 = vmatpush3.msra.mxu0 %v845_v4 }
 0x222   : > { %1333 = vmatprep.subr.mxu0 %v844_v5 }
 0x223   : > { %1334 = vmatpush3.msra.mxu0 %v844_v5 }
 0x224   : > { %1335 = vmatprep.subr.mxu0 %v843_v6 }
 0x225   : > { %1336 = vmatpush3.msra.mxu0 %v843_v6 }
 0x226   : > { %1337 = vmatprep.subr.mxu0 %v842_v7 }
 0x227   : > { %1338 = vmatpush3.msra.mxu0 %v842_v7 }
 0x228   : > { %1339 = vmatprep.subr.mxu0 %v841_v15 }
 0x229   : > { %1340 = vmatpush3.msra.mxu0 %v841_v15 }
 0x22a   : > { %1341 = vmatprep.subr.mxu0 %v840_v16 }
 0x22b   : > { %1342 = vmatpush3.msra.mxu0 %v840_v16 }
 0x22c   : > { %1343 = vmatprep.subr.mxu0 %v839_v17 }
 0x22d   : > { %1344 = vmatpush3.msra.mxu0 %v839_v17 }
 0x2ce   : > { %v714_v18 = vpop.f32.mrf.mxu0 }
 0x2cf   : > { %v1723_v19 = vadd.f32 %v830_v11, %v714_v18 }
 0x2d0   : > { %v716_v20 = vpop.f32.mrf.mxu0 }
 0x2d1   : > { %837 = vst [vmem:[%s329_s18] sm:$0xff] %v1723_v19  ;;  %1345 = vmatprep.mubr.f32.mxu0 %v1723_v19 }
 0x2d2   : > { %v717_v21 = vpop.f32.mrf.mxu0 }
 0x2d3   : > { %v1727_v22 = vadd.f32 %v833_v13, %v717_v21 }
 0x2d4   : > { %v719_v23 = vpop.f32.mrf.mxu0 }
 0x2d5   : > { %838 = vst [vmem:[%s329_s18 + $0x8] sm:$0xff] %v1727_v22  ;;  %1346 = vmatmul.mubr.f32.vlgmr.msra.gmra.mxu0 %v1727_v22 }
 0x395   : > { %v1347_v24 = vpop.f32.mrf.mxu0 }
 0x396   : > { %v931_v26 = vsel %vm338_vm0, %v1347_v24, 0.0 }
 0x397   : > { %v921_v25 = vpop.f32.mrf.mxu0 }
 0x398   : > { %v930_v27 = vsel %vm338_vm0, %v921_v25, 0.0 }
 0x399   : > { %v932_v28 = vadd.f32 %v931_v26, %v930_v27 }
 0x39b   : > { %v933_v29 = vrot.slane %v932_v28, 4 }
 0x39d   : > { %v934_v30 = vadd.f32 %v933_v29, %v932_v28 }
 0x39f   : > { %v935_v31 = vrot.slane %v934_v30, 2 }
 0x3a1   : > { %v936_v32 = vadd.f32 %v935_v31, %v934_v30 }
 0x3a3   : > { %v937_v33 = vrot.slane %v936_v32, 1 }
 0x3a5   : > { %v938_v34 = vadd.f32 %v937_v33, %v936_v32 }
 0x3a7   : > { %v1733_v35 = vmul.f32 0.00390625, %v938_v34 }
 0x3a9   : > { %947 = vrot.lane.b32.xlu0 %v1733_v35, %s1441_s23  ;;  %941 = vrot.lane.b32.xlu1 %v1733_v35, %s1442_s19 }
 0x3ad   : > { %953 = vrot.lane.b32.xlu0 %v1733_v35, %s1443_s20  ;;  %944 = vrot.lane.b32.xlu1 %v1733_v35, %s1444_s21 }
 0x3b1   : > { %959 = vrot.lane.b32.xlu0 %v1733_v35, %s1445_s22  ;;  %950 = vrot.lane.b32.xlu1 %v1733_v35, %s1446_s24 }
 0x3b5   : > { %965 = vrot.lane.b32.xlu0 %v1733_v35, %s1447_s25  ;;  %956 = vrot.lane.b32.xlu1 %v1733_v35, %s1448_s26 }
 0x3b9   : > { %971 = vrot.lane.b32.xlu0 %v1733_v35, %s1449_s30  ;;  %962 = vrot.lane.b32.xlu1 %v1733_v35, %s1439_s29  ;;  %s1217_s29 = sshll.u32 %s1782_s28, 1 }
 0x3ba   : > { %s333_s16 = scalar_lea.vmem %s1776_s8, %s1217_s29 }
 0x3bd   : > { %977 = vrot.lane.b32.xlu0 %v1733_v35, %s1450_s9  ;;  %968 = vrot.lane.b32.xlu1 %v1733_v35, %s1451_s10 }
 0x3c1   : > { %983 = vrot.lane.b32.xlu0 %v1733_v35, %s1452_s11  ;;  %974 = vrot.lane.b32.xlu1 %v1733_v35, %s1453_s12 }
 0x3c5   : > { %980 = vrot.lane.b32.xlu1 %v1733_v35, %s1454_s13 }
 0x41b   : > { %v948_v36 = vpop.permute.xlu0 %947  ;;  %v942_v37 = vpop.permute.xlu1 %941 }
 0x41c   : > { %v986_v38 = vsel %vm338_vm0, %v1733_v35, %v942_v37 }
 0x41f   : > { %v954_v39 = vpop.permute.xlu0 %953  ;;  %v945_v40 = vpop.permute.xlu1 %944 }
 0x420   : > { %v988_v41 = vsel %vm987_vm9, %v986_v38, %v945_v40 }
 0x421   : > { %v990_v43 = vsel %vm989_vm10, %v988_v41, %v948_v36 }
 0x423   : > { %v960_v42 = vpop.permute.xlu0 %959  ;;  %v951_v44 = vpop.permute.xlu1 %950 }
 0x424   : > { %v991_v45 = vsel %vm424_vm1, %v990_v43, %v951_v44  ;;  %vm1005_vm1 = vcmask 785408  }
 0x425   : > { %v993_v47 = vsel %vm992_vm11, %v991_v45, %v954_v39 }
 0x427   : > { %v966_v46 = vpop.permute.xlu0 %965  ;;  %v957_v48 = vpop.permute.xlu1 %956 }
 0x428   : > { %v995_v49 = vsel %vm994_vm12, %v993_v47, %v957_v48 }
 0x429   : > { %v997_v50 = vsel %vm996_vm13, %v995_v49, %v960_v42 }
 0x42b   : > { %v963_v51 = vpop.permute.xlu1 %962  ;;  %v972_v52 = vpop.permute.xlu0 %971 }
 0x42c   : > { %v998_v53 = vsel %vm555_vm5, %v997_v50, %v963_v51  ;;  %vm1107_vm5 = vcmask 58368  }
 0x42d   : > { %v1000_v55 = vsel %vm999_vm14, %v998_v53, %v966_v46 }
 0x42f   : > { %v969_v56 = vpop.permute.xlu1 %968  ;;  %v978_v58 = vpop.permute.xlu0 %977 }
 0x430   : > { %v1002_v57 = vsel %vm1001_vm15, %v1000_v55, %v969_v56 }
 0x431   : > { %v1004_v60 = vsel %vm1003_vm2, %v1002_v57, %v972_v52 }
 0x433   : > { %v975_v61 = vpop.permute.xlu1 %974  ;;  %v984_v2 = vpop.permute.xlu0 %983 }
 0x434   : > { %v1006_v62 = vsel %vm1005_vm1, %v1004_v60, %v975_v61 }
 0x435   : > { %v1008_v0 = vsel %vm1007_vm3, %v1006_v62, %v978_v58 }
 0x437   : > { %v981_v1 = vpop.permute.xlu1 %980 }
 0x438   : > { %v1010_v3 = vsel %vm1009_vm4, %v1008_v0, %v981_v1 }
 0x439   : > { %v1012_v4 = vsel %vm1011_vm7, %v1010_v3, %v984_v2 }
 0x43a   : > { %v1016_v5 = vrot.slane %v1012_v4, %v1015_v63 }
 0x43c   : > { %v1018_v6 = vsub.f32 %v1727_v22, %v1016_v5  ;;  %v1017_v7 = vsub.f32 %v1723_v19, %v1016_v5 }
 0x43e   : > { %v1019_v8 = vmul.f32 %v1017_v7, %v1017_v7  ;;  %v1020_v9 = vmul.f32 %v1018_v6, %v1018_v6 }
 0x440   : > { %1380 = vmatprep.mubr.f32.mxu1 %v1019_v8 }
 0x441   : > { %1381 = vmatmul.mubr.f32.vlgmr.msra.gmra.mxu1 %v1020_v9 }
 0x501   : > { %v1382_v10 = vpop.f32.mrf.mxu1 }
 0x502   : > { %v1097_v12 = vsel %vm338_vm0, %v1382_v10, 0.0 }
 0x503   : > { %v1087_v11 = vpop.f32.mrf.mxu1 }
 0x504   : > { %v1096_v13 = vsel %vm338_vm0, %v1087_v11, 0.0 }
 0x505   : > { %v1098_v14 = vadd.f32 %v1097_v12, %v1096_v13 }
 0x507   : > { %v1099_v15 = vrot.slane %v1098_v14, 4 }
 0x509   : > { %v1100_v16 = vadd.f32 %v1099_v15, %v1098_v14 }
 0x50b   : > { %v1101_v17 = vrot.slane %v1100_v16, 2 }
 0x50d   : > { %v1102_v18 = vadd.f32 %v1101_v17, %v1100_v16 }
 0x50f   : > { %v1103_v20 = vrot.slane %v1102_v18, 1 }
 0x511   : > { %v1104_v19 = vadd.f32 %v1103_v20, %v1102_v18 }
 0x513   : > { %v1106_v21 = vsel %vm541_vm6, %v1733_v35, %v1104_v19 }
 0x514   : > { %1108 = vst.msk [vmem:[%s333_s16] sm:$0x3] %vm1107_vm5, %v1106_v21 }
 0x515 PF: > { %s19_s27 = sadd.s32 1, %s1437_s27  }
 0x516   : > { %p16_p4 = scmp.ge.s32.totalorder %s19_s27, 4  }
 0x518   :  { %18 = sbr.rel (!%p16_p4) target bundleno = 1 (0x1), region = 93 }

</bundles_post_ra>
